<compile_context>
chip_gen: v5e
topology: v5e:2x2
jax: 0.10.0
libtpu: 0.0.40
codegen_flags: <defaults>
</compile_context>

<pallas_src>
import functools
import math

import jax
import jax.numpy as jnp
import numpy as np
from jax import lax
from jax.experimental import pallas as pl
from jax.experimental.pallas import tpu as pltpu


def _bilstm_kernel(x_ref, wih_ref, whh_ref, b_ref, o_ref, gx_sc, h_sc, c_sc):
    """One (direction, time-chunk) grid step of the LSTM recurrence.

    x_ref  : (T_CHUNK*Bp, D_in)  VMEM  time-major input, flattened over (t, b)
    wih_ref: (D_in, 4*Hp)        VMEM  (= W_ih^T, gates [i,f,o,g], padded to Hp)
    whh_ref: (Hp, 4*Hp)          VMEM  f32 (= W_hh^T, gates [i,f,o,g], padded)
    b_ref  : (1, 4*Hp)           VMEM  f32 (= b_ih + b_hh, padded)
    o_ref  : (T_CHUNK, Bp, Hp)   VMEM  output block
    gx_sc  : (T_CHUNK*Bp, 4*Hp)  f32 scratch (hoisted input projection)
    h_sc, c_sc: (Bp, Hp)         f32 scratch, carried across the chunk axis
    """
    t_chunk, b_sz, hp = o_ref.shape

    # New direction starts: reset the recurrent state.
    @pl.when(pl.program_id(1) == 0)
    def _init():
        h_sc[...] = jnp.zeros_like(h_sc)
        c_sc[...] = jnp.zeros_like(c_sc)

    # Hoisted input projection for the whole chunk: one big MXU matmul with the
    # bias folded in (broadcast happens once per chunk, not once per timestep).
    # TODO(synk): interleave this projection with the recurrence in lookahead
    # sub-blocks so its vmatmul pushes hide under the per-step EUP/VPU work.
    gx_sc[...] = (
        jnp.dot(x_ref[...], wih_ref[...], preferred_element_type=jnp.float32)
        + b_ref[...]
    )

    # Recurrent weights stay f32 (error does not compound over T).
    # TODO(synk): hold W_hh weight-stationary across the step loop via
    # pltpu.matmul_push_rhs / matmul_acc_lhs / matmul_pop to take the per-step
    # weight stream off the serial critical path.
    whh = whh_ref[...]

    def step(t, carry):
        h = h_sc[...]
        c = c_sc[...]
        # Bp is a multiple of 8 -> the slice start is sublane-aligned.
        row0 = pl.multiple_of(t * b_sz, 8)
        gates = gx_sc[pl.ds(row0, b_sz), :] + jnp.dot(
            h, whh, preferred_element_type=jnp.float32
        )                                                     # (Bp, 4*Hp)
        # Gate order [i, f, o, g]: one sigmoid over a contiguous (Bp, 3*Hp)
        # slab, one tanh over the last Hp lanes.  Slices are 128-aligned.
        sig = jax.nn.sigmoid(gates[:, : 3 * hp])
        i_g = sig[:, 0 * hp:1 * hp]
        f_g = sig[:, 1 * hp:2 * hp]
        o_g = sig[:, 2 * hp:3 * hp]
        g_g = jnp.tanh(gates[:, 3 * hp:])
        c_new = f_g * c + i_g * g_g
        h_new = o_g * jnp.tanh(c_new)
        c_sc[...] = c_new
        h_sc[...] = h_new
        o_ref[t] = h_new.astype(o_ref.dtype)                  # lane-dense store
        return carry

    # Fixed partial unroll: scheduler visibility with bounded vreg live ranges
    # (full unroll of large chunks would bloat code / spill; unroll=False loses
    # ~35% on visible loops).
    lax.fori_loop(0, t_chunk, step, 0, unroll=min(8, t_chunk))


def _run_bilstm(x_all, wih_all, whh_all, b_all, *, t_chunk, b_sz, vmem_limit):
    """x_all: (2, T_pad*Bp, D_in).  Returns (2, T_pad, Bp, Hp) float32."""
    n_dir, tb_total, d_in = x_all.shape
    hp4 = wih_all.shape[-1]
    hp = hp4 // 4
    t_pad = tb_total // b_sz
    n_chunks = t_pad // t_chunk

    return pl.pallas_call(
        _bilstm_kernel,
        out_shape=jax.ShapeDtypeStruct((n_dir, t_pad, b_sz, hp), jnp.float32),
        grid_spec=pltpu.PrefetchScalarGridSpec(
            num_scalar_prefetch=0,
            grid=(n_dir, n_chunks),
            in_specs=[
                # x chunk: default double-buffered DMA overlaps the recurrence.
                pl.BlockSpec((None, t_chunk * b_sz, d_in), lambda d, c: (d, c, 0)),
                # Per-direction weights/bias: constant along the chunk axis ->
                # single-buffer them (no wasted 2x VMEM for operands that never
                # re-DMA); they stay resident for the whole direction.
                pl.BlockSpec((None, d_in, hp4), lambda d, c: (d, 0, 0),
                             pipeline_mode=pl.Buffered(1)),
                pl.BlockSpec((None, hp, hp4), lambda d, c: (d, 0, 0),
                             pipeline_mode=pl.Buffered(1)),
                pl.BlockSpec((None, 1, hp4), lambda d, c: (d, 0, 0),
                             pipeline_mode=pl.Buffered(1)),
            ],
            out_specs=pl.BlockSpec(
                (None, t_chunk, b_sz, hp), lambda d, c: (d, c, 0, 0)
            ),
            scratch_shapes=[
                pltpu.VMEM((t_chunk * b_sz, hp4), jnp.float32),  # hoisted gx
                pltpu.VMEM((b_sz, hp), jnp.float32),             # h state
                pltpu.VMEM((b_sz, hp), jnp.float32),             # c state
            ],
        ),
        compiler_params=pltpu.CompilerParams(
            # Direction axis parallel (2 TCs on v7x run fwd/bwd concurrently,
            # each holding only its own direction's weights); chunk axis is
            # sequential because h/c scratch carries state across chunks.
            dimension_semantics=("parallel", "arbitrary"),
            vmem_limit_bytes=int(vmem_limit),
        ),
    )(x_all, wih_all, whh_all, b_all)


def _round_up(n, m):
    return ((n + m - 1) // m) * m


def _vmem_budget_bytes():
    """Generation-aware VMEM budget (leaves headroom for compiler scratch)."""
    cap = 64 << 20  # conservative fallback: safe on v5e/v6e/v7x
    try:
        info = pltpu.get_tpu_info()
        for name in ("vmem_capacity_bytes", "vmem_size_bytes", "vmem_bytes"):
            v = getattr(info, name, None)
            if v:
                cap = int(v)
                break
    except Exception:
        pass
    # 3/4 of physical, capped at 96 MiB: ~48 MiB on v7x (64 MiB), ~96 MiB on
    # v5e/v6e (128 MiB physical).
    return min(cap * 3 // 4, 96 << 20)


def _pad_gates(w, h, hp):
    """(K, 4*h) in [i,f,g,o] order -> (K, 4*hp) in [i,f,o,g] order.

    Each gate's columns are zero-padded from h to hp so every gate starts at a
    128-aligned lane offset g*hp (lane-dense slices / stores in the kernel).
    """
    k = w.shape[0]
    w4 = w.reshape(k, 4, h)
    w4 = w4[:, jnp.array([0, 1, 3, 2]), :]      # reorder gates to i, f, o, g
    w4 = jnp.pad(w4, ((0, 0), (0, 0), (0, hp - h)))
    return w4.reshape(k, 4 * hp)


@functools.partial(jax.jit, static_argnames=("t_chunk", "matmul_dtype"))
def rnn_forward(x, x_len, params, *, t_chunk=None, matmul_dtype=jnp.float32):
    """Bidirectional LSTM with packed-sequence semantics.

    x: (B, T, D_in) batch_first, x_len: (B,) int32.
    Returns: (B, T, 2*H) float32 with rows t >= x_len[b] zeroed.

    matmul_dtype only affects the hoisted x @ W_ih projection (use bf16 on any
    generation to halve the x DMA stream / W_ih VMEM); the recurrent matmul,
    state and accumulation stay f32.
    """
    B, T, D = x.shape
    wih_f, whh_f, b_f, wih_b, whh_b, b_b = params
    H = whh_f.shape[0]
    Hp = _round_up(H, 128)          # lane-dense gates / output
    Bp = _round_up(B, 8)            # full sublane tile for the f32 state path
    in_bytes = jnp.dtype(matmul_dtype).itemsize

    # ---- weights: reorder gates, pad per-gate to Hp, stack directions -------
    def prep(wih, whh, b):
        wih_p = _pad_gates(wih, H, Hp)                                  # (D, 4Hp)
        whh_p = jnp.pad(_pad_gates(whh, H, Hp), ((0, Hp - H), (0, 0)))  # (Hp, 4Hp)
        b_p = _pad_gates(b, H, Hp)                                      # (1, 4Hp)
        return wih_p, whh_p, b_p

    wih_fp, whh_fp, b_fp = prep(wih_f, whh_f, b_f)
    wih_bp, whh_bp, b_bp = prep(wih_b, whh_b, b_b)
    wih_all = jnp.stack([wih_fp, wih_bp]).astype(matmul_dtype)
    whh_all = jnp.stack([whh_fp, whh_bp]).astype(jnp.float32)  # recurrence f32
    b_all = jnp.stack([b_fp, b_bp]).astype(jnp.float32)

    # ---- packed-sequence glue (reverse each sequence inside its length) -----
    # TODO(synk): fold the validity mask / per-sequence reversal into the
    # kernel via scalar-prefetched x_len to avoid these extra HBM passes.
    t_idx = jnp.arange(T)
    valid = t_idx[None, :] < x_len[:, None]                  # (B, T)
    rev_idx_c = jnp.clip(x_len[:, None] - 1 - t_idx[None, :], 0, T - 1)
    x_rev = jnp.take_along_axis(x, rev_idx_c[:, :, None], axis=1)
    x_rev = jnp.where(valid[:, :, None], x_rev, 0.0)

    x_fwd_tm = jnp.transpose(x, (1, 0, 2))                   # (T, B, D)
    x_rev_tm = jnp.transpose(x_rev, (1, 0, 2))
    x_all = jnp.stack([x_fwd_tm, x_rev_tm], axis=0)          # (2, T, B, D)
    if Bp != B:                                              # pad batch -> Bp
        x_all = jnp.pad(x_all, ((0, 0), (0, 0), (0, Bp - B), (0, 0)))

    # ---- chunking along time (generation-aware VMEM + DMA/compute overlap) --
    budget = _vmem_budget_bytes()
    # (t_chunk*Bp) rows of the x block must be a multiple of the matmul dtype's
    # sublane packing (8 rows f32, 16 rows bf16, ...).
    sub_rows = max(8, 32 // max(in_bytes, 1))
    align = sub_rows // math.gcd(Bp, sub_rows)
    if t_chunk is None:
        # Resident single-buffered weights/bias + per-timestep streams
        # (2x double-buffered x, 2x double-buffered o, gx scratch).
        const = D * 4 * Hp * in_bytes + Hp * 4 * Hp * 4 + 4 * Hp * 4
        per_t = Bp * (2 * D * in_bytes + 2 * Hp * 4 + 4 * Hp * 4)
        avail = max(budget - const - (8 << 20), per_t)
        t_chunk = int(max(1, min(T, avail // per_t, 256)))
    t_chunk = _round_up(max(1, int(t_chunk)), align)
    T_pad = _round_up(T, t_chunk)
    if T_pad != T:
        x_all = jnp.pad(x_all, ((0, 0), (0, T_pad - T), (0, 0), (0, 0)))
    x_all = x_all.reshape(2, T_pad * Bp, D).astype(matmul_dtype)

    o_all = _run_bilstm(x_all, wih_all, whh_all, b_all,
                        t_chunk=t_chunk, b_sz=Bp,
                        vmem_limit=budget)                   # (2, T_pad, Bp, Hp)
    o_all = o_all[:, :T, :B, :H]

    h_fwd = jnp.transpose(o_all[0], (1, 0, 2))               # (B, T, H)
    h_fwd = jnp.where(valid[:, :, None], h_fwd, 0.0)
    h_bwd_rev = jnp.transpose(o_all[1], (1, 0, 2))
    h_bwd = jnp.take_along_axis(h_bwd_rev, rev_idx_c[:, :, None], axis=1)
    h_bwd = jnp.where(valid[:, :, None], h_bwd, 0.0)
    return jnp.concatenate([h_fwd, h_bwd], axis=-1)          # (B, T, 2H)


def _lstm_ref(x_tm, wih_t, whh_t, b):
    """Pure-JAX reference for the single-direction recurrence (unpadded)."""
    _, B, _ = x_tm.shape
    H = whh_t.shape[0]

    def step(carry, x_t):
        h, c = carry
        gates = x_t @ wih_t + h @ whh_t + b
        i_g = jax.nn.sigmoid(gates[:, :H])
        f_g = jax.nn.sigmoid(gates[:, H:2 * H])
        g_g = jnp.tanh(gates[:, 2 * H:3 * H])
        o_g = jax.nn.sigmoid(gates[:, 3 * H:])
        c = f_g * c + i_g * g_g
        h = o_g * jnp.tanh(c)
        return (h, c), h

    (_, _), hs = lax.scan(
        step, (jnp.zeros((B, H), jnp.float32), jnp.zeros((B, H), jnp.float32)), x_tm
    )
    return hs


def _init_params(key, d_in, d_out):
    """Deterministic LSTM params (PyTorch-style uniform(-1/sqrt(H), 1/sqrt(H)))."""
    H = d_out
    k = 1.0 / np.sqrt(H)
    keys = jax.random.split(key, 8)

    def u(kk, shape):
        return jax.random.uniform(kk, shape, jnp.float32, -k, k)

    # forward direction (pre-transposed: W^T), gate order [i, f, g, o]
    wih_f = u(keys[0], (d_in, 4 * H))
    whh_f = u(keys[1], (H, 4 * H))
    b_f = u(keys[2], (1, 4 * H)) + u(keys[3], (1, 4 * H))   # b_ih + b_hh
    # reverse direction
    wih_b = u(keys[4], (d_in, 4 * H))
    whh_b = u(keys[5], (H, 4 * H))
    b_b = u(keys[6], (1, 4 * H)) + u(keys[7], (1, 4 * H))
    return (wih_f, whh_f, b_f, wih_b, whh_b, b_b)


if __name__ == "__main__":
    B, T, D_IN, D_OUT = 2, 8, 16, 32

    key = jax.random.PRNGKey(0)
    k_x, k_p = jax.random.split(key)
    x = jax.random.normal(k_x, (B, T, D_IN), jnp.float32)
    x_len = jnp.array([8, 5], dtype=jnp.int32)
    params = _init_params(k_p, D_IN, D_OUT)

    # t_chunk=4 -> grid=(2 directions, 2 chunks): exercises the carried state.
    out = rnn_forward(x, x_len, params, t_chunk=4)
    out = jax.block_until_ready(out)
    assert out.shape == (B, T, 2 * D_OUT), out.shape

    # --- verify kernel recurrence against a pure-JAX lax.scan reference ------
    wih_f, whh_f, b_f, wih_b, whh_b, b_b = params
    t_idx = jnp.arange(T)
    valid = (t_idx[None, :] < x_len[:, None])
    rev_idx_c = jnp.clip(x_len[:, None] - 1 - t_idx[None, :], 0, T - 1)
    x_rev = jnp.where(
        valid[:, :, None], jnp.take_along_axis(x, rev_idx_c[:, :, None], axis=1), 0.0
    )
    h_f_ref = jnp.transpose(
        _lstm_ref(jnp.transpose(x, (1, 0, 2)), wih_f, whh_f, b_f), (1, 0, 2))
    h_f_ref = jnp.where(valid[:, :, None], h_f_ref, 0.0)
    h_b_ref = jnp.transpose(
        _lstm_ref(jnp.transpose(x_rev, (1, 0, 2)), wih_b, whh_b, b_b), (1, 0, 2))
    h_b_ref = jnp.take_along_axis(h_b_ref, rev_idx_c[:, :, None], axis=1)
    h_b_ref = jnp.where(valid[:, :, None], h_b_ref, 0.0)
    ref = jnp.concatenate([h_f_ref, h_b_ref], axis=-1)
    np.testing.assert_allclose(np.asarray(out), np.asarray(ref), rtol=1e-4, atol=1e-4)

    # padded positions must be exactly zero (pad_packed_sequence semantics)
    assert np.all(np.asarray(out)[1, 5:, :] == 0.0)

    # --- bf16 input-projection fast path (all generations): recurrence stays
    #     f32, so only the hoisted x @ W_ih is lower precision. ---------------
    out_bf16 = jax.block_until_ready(
        rnn_forward(x, x_len, params, t_chunk=4, matmul_dtype=jnp.bfloat16))
    np.testing.assert_allclose(np.asarray(out_bf16), np.asarray(ref),
                               rtol=0, atol=5e-2)

    print("KERNEL_OK")
</pallas_src>

<mosaic_0001>
module attributes {stable_mosaic.version = 11 : i64} {
  func.func @_bilstm_kernel(%arg0: i32, %arg1: i32, %arg2: memref<1x32x16xf32, #tpu.memory_space<vmem>>, %arg3: memref<1x16x512xf32, #tpu.memory_space<vmem>>, %arg4: memref<1x128x512xf32, #tpu.memory_space<vmem>>, %arg5: memref<1x1x512xf32, #tpu.memory_space<vmem>>, %arg6: memref<1x4x8x128xf32, #tpu.memory_space<vmem>>, %arg7: memref<32x512xf32, #tpu.memory_space<vmem>>, %arg8: memref<8x128xf32, #tpu.memory_space<vmem>>, %arg9: memref<8x128xf32, #tpu.memory_space<vmem>>) attributes {dimension_semantics = [#tpu.dimension_semantics<parallel>, #tpu.dimension_semantics<arbitrary>], iteration_bounds = array<i64: 2, 2>, scalar_prefetch = 0 : i64, scratch_operands = 3 : i64, tpu.core_type = #tpu.core_type<tc>, window_params = [{transform_indices = @transform_0, window_bounds = array<i64: 1, 32, 16>}, {pipeline_mode = #tpu.pipeline_mode<synchronous>, transform_indices = @transform_1, window_bounds = array<i64: 1, 16, 512>}, {pipeline_mode = #tpu.pipeline_mode<synchronous>, transform_indices = @transform_2, window_bounds = array<i64: 1, 128, 512>}, {pipeline_mode = #tpu.pipeline_mode<synchronous>, transform_indices = @transform_3, window_bounds = array<i64: 1, 1, 512>}, {transform_indices = @transform_4, window_bounds = array<i64: 1, 4, 8, 128>}]} {
    %c0_i32 = arith.constant 0 : i32
    %0 = arith.cmpi eq, %arg1, %c0_i32 : i32
    %1 = arith.extui %0 : i1 to i32
    %c0_i32_0 = arith.constant 0 : i32
    %2 = arith.cmpi ne, %1, %c0_i32_0 : i32
    scf.if %2 {
      %cst_74 = arith.constant 0.000000e+00 : f32
      %135 = vector.broadcast %cst_74 : f32 to vector<8x128xf32>
      %c0_75 = arith.constant 0 : index
      %c0_76 = arith.constant 0 : index
      %136 = vector.load %arg8[%c0_75, %c0_76] : memref<8x128xf32, #tpu.memory_space<vmem>>, vector<8x128xf32>
      tpu.vector_store %arg8[%c0_75, %c0_76], %135 {strides = array<i32>} : memref<8x128xf32, #tpu.memory_space<vmem>>, vector<8x128xf32>,
      %cst_77 = arith.constant 0.000000e+00 : f32
      %137 = vector.broadcast %cst_77 : f32 to vector<8x128xf32>
      %c0_78 = arith.constant 0 : index
      %c0_79 = arith.constant 0 : index
      %138 = vector.load %arg9[%c0_78, %c0_79] : memref<8x128xf32, #tpu.memory_space<vmem>>, vector<8x128xf32>
      tpu.vector_store %arg9[%c0_78, %c0_79], %137 {strides = array<i32>} : memref<8x128xf32, #tpu.memory_space<vmem>>, vector<8x128xf32>,
    } else {
    }
    %c0 = arith.constant 0 : index
    %c0_1 = arith.constant 0 : index
    %c0_2 = arith.constant 0 : index
    %3 = vector.load %arg2[%c0, %c0_1, %c0_2] : memref<1x32x16xf32, #tpu.memory_space<vmem>>, vector<1x32x16xf32>
    %4 = vector.shape_cast %3 : vector<1x32x16xf32> to vector<32x16xf32>
    %c0_3 = arith.constant 0 : index
    %c0_4 = arith.constant 0 : index
    %c0_5 = arith.constant 0 : index
    %5 = vector.load %arg3[%c0_3, %c0_4, %c0_5] : memref<1x16x512xf32, #tpu.memory_space<vmem>>, vector<1x16x512xf32>
    %6 = vector.shape_cast %5 : vector<1x16x512xf32> to vector<16x512xf32>
    %cst = arith.constant dense<0.000000e+00> : vector<32x512xf32>
    %7 = tpu.matmul %4, %6, %cst {dimension_numbers = #tpu.dot_dimension_numbers<[1], [0], [0], [1], [0, 0, 1, 1], [], []>} : vector<32x16xf32>, vector<16x512xf32>, vector<32x512xf32> -> vector<32x512xf32>
    %c0_6 = arith.constant 0 : index
    %c0_7 = arith.constant 0 : index
    %c0_8 = arith.constant 0 : index
    %8 = vector.load %arg5[%c0_6, %c0_7, %c0_8] : memref<1x1x512xf32, #tpu.memory_space<vmem>>, vector<1x1x512xf32>
    %9 = vector.shape_cast %8 : vector<1x1x512xf32> to vector<1x512xf32>
    %10 = vector.broadcast %9 : vector<1x512xf32> to vector<32x512xf32>
    %11 = arith.addf %7, %10 : vector<32x512xf32>
    %c0_9 = arith.constant 0 : index
    %c0_10 = arith.constant 0 : index
    %12 = vector.load %arg7[%c0_9, %c0_10] : memref<32x512xf32, #tpu.memory_space<vmem>>, vector<32x512xf32>
    tpu.vector_store %arg7[%c0_9, %c0_10], %11 {strides = array<i32>} : memref<32x512xf32, #tpu.memory_space<vmem>>, vector<32x512xf32>,
    %c0_11 = arith.constant 0 : index
    %c0_12 = arith.constant 0 : index
    %c0_13 = arith.constant 0 : index
    %13 = vector.load %arg4[%c0_11, %c0_12, %c0_13] : memref<1x128x512xf32, #tpu.memory_space<vmem>>, vector<1x128x512xf32>
    %14 = vector.shape_cast %13 : vector<1x128x512xf32> to vector<128x512xf32>
    %c0_i32_14 = arith.constant 0 : i32
    %c0_15 = arith.constant 0 : index
    %c0_16 = arith.constant 0 : index
    %15 = vector.load %arg8[%c0_15, %c0_16] : memref<8x128xf32, #tpu.memory_space<vmem>>, vector<8x128xf32>
    %c0_17 = arith.constant 0 : index
    %c0_18 = arith.constant 0 : index
    %16 = vector.load %arg9[%c0_17, %c0_18] : memref<8x128xf32, #tpu.memory_space<vmem>>, vector<8x128xf32>
    %c8_i32 = arith.constant 8 : i32
    %17 = arith.muli %c0_i32_14, %c8_i32 : i32
    %18 = tpu.assume_multiple %17, 8 : i32
    %19 = arith.index_cast %18 : i32 to index
    %c0_19 = arith.constant 0 : index
    %20 = vector.load %arg7[%19, %c0_19] : memref<32x512xf32, #tpu.memory_space<vmem>>, vector<8x512xf32>
    %cst_20 = arith.constant dense<0.000000e+00> : vector<8x512xf32>
    %21 = tpu.matmul %15, %14, %cst_20 {dimension_numbers = #tpu.dot_dimension_numbers<[1], [0], [0], [1], [0, 0, 1, 1], [], []>} : vector<8x128xf32>, vector<128x512xf32>, vector<8x512xf32> -> vector<8x512xf32>
    %22 = arith.addf %20, %21 : vector<8x512xf32>
    %23 = vector.extract_strided_slice %22 {offsets = [0, 0], sizes = [8, 384], strides = [1, 1]} : vector<8x512xf32> to vector<8x384xf32>
    %24 = arith.negf %23 : vector<8x384xf32>
    %25 = math.exp %24 : vector<8x384xf32>
    %cst_21 = arith.constant 1.000000e+00 : f32
    %26 = vector.broadcast %cst_21 : f32 to vector<8x384xf32>
    %27 = arith.addf %26, %25 : vector<8x384xf32>
    %28 = arith.divf %26, %27 : vector<8x384xf32>
    %29 = vector.extract_strided_slice %28 {offsets = [0, 0], sizes = [8, 128], strides = [1, 1]} : vector<8x384xf32> to vector<8x128xf32>
    %30 = vector.extract_strided_slice %28 {offsets = [0, 128], sizes = [8, 128], strides = [1, 1]} : vector<8x384xf32> to vector<8x128xf32>
    %31 = vector.extract_strided_slice %28 {offsets = [0, 256], sizes = [8, 128], strides = [1, 1]} : vector<8x384xf32> to vector<8x128xf32>
    %32 = vector.extract_strided_slice %22 {offsets = [0, 384], sizes = [8, 128], strides = [1, 1]} : vector<8x512xf32> to vector<8x128xf32>
    %33 = math.tanh %32 : vector<8x128xf32>
    %34 = arith.mulf %30, %16 : vector<8x128xf32>
    %35 = arith.mulf %29, %33 : vector<8x128xf32>
    %36 = arith.addf %34, %35 : vector<8x128xf32>
    %37 = math.tanh %36 : vector<8x128xf32>
    %38 = arith.mulf %31, %37 : vector<8x128xf32>
    %c0_22 = arith.constant 0 : index
    %c0_23 = arith.constant 0 : index
    %39 = vector.load %arg9[%c0_22, %c0_23] : memref<8x128xf32, #tpu.memory_space<vmem>>, vector<8x128xf32>
    tpu.vector_store %arg9[%c0_22, %c0_23], %36 {strides = array<i32>} : memref<8x128xf32, #tpu.memory_space<vmem>>, vector<8x128xf32>,
    %c0_24 = arith.constant 0 : index
    %c0_25 = arith.constant 0 : index
    %40 = vector.load %arg8[%c0_24, %c0_25] : memref<8x128xf32, #tpu.memory_space<vmem>>, vector<8x128xf32>
    tpu.vector_store %arg8[%c0_24, %c0_25], %38 {strides = array<i32>} : memref<8x128xf32, #tpu.memory_space<vmem>>, vector<8x128xf32>,
    %c0_26 = arith.constant 0 : index
    %41 = arith.index_cast %c0_i32_14 : i32 to index
    %c0_27 = arith.constant 0 : index
    %c0_28 = arith.constant 0 : index
    %42 = vector.load %arg6[%c0_26, %41, %c0_27, %c0_28] : memref<1x4x8x128xf32, #tpu.memory_space<vmem>>, vector<1x1x8x128xf32>
    %43 = vector.shape_cast %42 : vector<1x1x8x128xf32> to vector<8x128xf32>
    %44 = vector.shape_cast %38 : vector<8x128xf32> to vector<1x1x8x128xf32>
    tpu.vector_store %arg6[%c0_26, %41, %c0_27, %c0_28], %44 {strides = array<i32>} : memref<1x4x8x128xf32, #tpu.memory_space<vmem>>, vector<1x1x8x128xf32>,
    %c1_i32 = arith.constant 1 : i32
    %c0_29 = arith.constant 0 : index
    %c0_30 = arith.constant 0 : index
    %45 = vector.load %arg8[%c0_29, %c0_30] : memref<8x128xf32, #tpu.memory_space<vmem>>, vector<8x128xf32>
    %c0_31 = arith.constant 0 : index
    %c0_32 = arith.constant 0 : index
    %46 = vector.load %arg9[%c0_31, %c0_32] : memref<8x128xf32, #tpu.memory_space<vmem>>, vector<8x128xf32>
    %c8_i32_33 = arith.constant 8 : i32
    %47 = arith.muli %c1_i32, %c8_i32_33 : i32
    %48 = tpu.assume_multiple %47, 8 : i32
    %49 = arith.index_cast %48 : i32 to index
    %c0_34 = arith.constant 0 : index
    %50 = vector.load %arg7[%49, %c0_34] : memref<32x512xf32, #tpu.memory_space<vmem>>, vector<8x512xf32>
    %cst_35 = arith.constant dense<0.000000e+00> : vector<8x512xf32>
    %51 = tpu.matmul %45, %14, %cst_35 {dimension_numbers = #tpu.dot_dimension_numbers<[1], [0], [0], [1], [0, 0, 1, 1], [], []>} : vector<8x128xf32>, vector<128x512xf32>, vector<8x512xf32> -> vector<8x512xf32>
    %52 = arith.addf %50, %51 : vector<8x512xf32>
    %53 = vector.extract_strided_slice %52 {offsets = [0, 0], sizes = [8, 384], strides = [1, 1]} : vector<8x512xf32> to vector<8x384xf32>
    %54 = arith.negf %53 : vector<8x384xf32>
    %55 = math.exp %54 : vector<8x384xf32>
    %cst_36 = arith.constant 1.000000e+00 : f32
    %56 = vector.broadcast %cst_36 : f32 to vector<8x384xf32>
    %57 = arith.addf %56, %55 : vector<8x384xf32>
    %58 = arith.divf %56, %57 : vector<8x384xf32>
    %59 = vector.extract_strided_slice %58 {offsets = [0, 0], sizes = [8, 128], strides = [1, 1]} : vector<8x384xf32> to vector<8x128xf32>
    %60 = vector.extract_strided_slice %58 {offsets = [0, 128], sizes = [8, 128], strides = [1, 1]} : vector<8x384xf32> to vector<8x128xf32>
    %61 = vector.extract_strided_slice %58 {offsets = [0, 256], sizes = [8, 128], strides = [1, 1]} : vector<8x384xf32> to vector<8x128xf32>
    %62 = vector.extract_strided_slice %52 {offsets = [0, 384], sizes = [8, 128], strides = [1, 1]} : vector<8x512xf32> to vector<8x128xf32>
    %63 = math.tanh %62 : vector<8x128xf32>
    %64 = arith.mulf %60, %46 : vector<8x128xf32>
    %65 = arith.mulf %59, %63 : vector<8x128xf32>
    %66 = arith.addf %64, %65 : vector<8x128xf32>
    %67 = math.tanh %66 : vector<8x128xf32>
    %68 = arith.mulf %61, %67 : vector<8x128xf32>
    %c0_37 = arith.constant 0 : index
    %c0_38 = arith.constant 0 : index
    %69 = vector.load %arg9[%c0_37, %c0_38] : memref<8x128xf32, #tpu.memory_space<vmem>>, vector<8x128xf32>
    tpu.vector_store %arg9[%c0_37, %c0_38], %66 {strides = array<i32>} : memref<8x128xf32, #tpu.memory_space<vmem>>, vector<8x128xf32>,
    %c0_39 = arith.constant 0 : index
    %c0_40 = arith.constant 0 : index
    %70 = vector.load %arg8[%c0_39, %c0_40] : memref<8x128xf32, #tpu.memory_space<vmem>>, vector<8x128xf32>
    tpu.vector_store %arg8[%c0_39, %c0_40], %68 {strides = array<i32>} : memref<8x128xf32, #tpu.memory_space<vmem>>, vector<8x128xf32>,
    %c0_41 = arith.constant 0 : index
    %71 = arith.index_cast %c1_i32 : i32 to index
    %c0_42 = arith.constant 0 : index
    %c0_43 = arith.constant 0 : index
    %72 = vector.load %arg6[%c0_41, %71, %c0_42, %c0_43] : memref<1x4x8x128xf32, #tpu.memory_space<vmem>>, vector<1x1x8x128xf32>
    %73 = vector.shape_cast %72 : vector<1x1x8x128xf32> to vector<8x128xf32>
    %74 = vector.shape_cast %68 : vector<8x128xf32> to vector<1x1x8x128xf32>
    tpu.vector_store %arg6[%c0_41, %71, %c0_42, %c0_43], %74 {strides = array<i32>} : memref<1x4x8x128xf32, #tpu.memory_space<vmem>>, vector<1x1x8x128xf32>,
    %c2_i32 = arith.constant 2 : i32
    %c0_44 = arith.constant 0 : index
    %c0_45 = arith.constant 0 : index
    %75 = vector.load %arg8[%c0_44, %c0_45] : memref<8x128xf32, #tpu.memory_space<vmem>>, vector<8x128xf32>
    %c0_46 = arith.constant 0 : index
    %c0_47 = arith.constant 0 : index
    %76 = vector.load %arg9[%c0_46, %c0_47] : memref<8x128xf32, #tpu.memory_space<vmem>>, vector<8x128xf32>
    %c8_i32_48 = arith.constant 8 : i32
    %77 = arith.muli %c2_i32, %c8_i32_48 : i32
    %78 = tpu.assume_multiple %77, 8 : i32
    %79 = arith.index_cast %78 : i32 to index
    %c0_49 = arith.constant 0 : index
    %80 = vector.load %arg7[%79, %c0_49] : memref<32x512xf32, #tpu.memory_space<vmem>>, vector<8x512xf32>
    %cst_50 = arith.constant dense<0.000000e+00> : vector<8x512xf32>
    %81 = tpu.matmul %75, %14, %cst_50 {dimension_numbers = #tpu.dot_dimension_numbers<[1], [0], [0], [1], [0, 0, 1, 1], [], []>} : vector<8x128xf32>, vector<128x512xf32>, vector<8x512xf32> -> vector<8x512xf32>
    %82 = arith.addf %80, %81 : vector<8x512xf32>
    %83 = vector.extract_strided_slice %82 {offsets = [0, 0], sizes = [8, 384], strides = [1, 1]} : vector<8x512xf32> to vector<8x384xf32>
    %84 = arith.negf %83 : vector<8x384xf32>
    %85 = math.exp %84 : vector<8x384xf32>
    %cst_51 = arith.constant 1.000000e+00 : f32
    %86 = vector.broadcast %cst_51 : f32 to vector<8x384xf32>
    %87 = arith.addf %86, %85 : vector<8x384xf32>
    %88 = arith.divf %86, %87 : vector<8x384xf32>
    %89 = vector.extract_strided_slice %88 {offsets = [0, 0], sizes = [8, 128], strides = [1, 1]} : vector<8x384xf32> to vector<8x128xf32>
    %90 = vector.extract_strided_slice %88 {offsets = [0, 128], sizes = [8, 128], strides = [1, 1]} : vector<8x384xf32> to vector<8x128xf32>
    %91 = vector.extract_strided_slice %88 {offsets = [0, 256], sizes = [8, 128], strides = [1, 1]} : vector<8x384xf32> to vector<8x128xf32>
    %92 = vector.extract_strided_slice %82 {offsets = [0, 384], sizes = [8, 128], strides = [1, 1]} : vector<8x512xf32> to vector<8x128xf32>
    %93 = math.tanh %92 : vector<8x128xf32>
    %94 = arith.mulf %90, %76 : vector<8x128xf32>
    %95 = arith.mulf %89, %93 : vector<8x128xf32>
    %96 = arith.addf %94, %95 : vector<8x128xf32>
    %97 = math.tanh %96 : vector<8x128xf32>
    %98 = arith.mulf %91, %97 : vector<8x128xf32>
    %c0_52 = arith.constant 0 : index
    %c0_53 = arith.constant 0 : index
    %99 = vector.load %arg9[%c0_52, %c0_53] : memref<8x128xf32, #tpu.memory_space<vmem>>, vector<8x128xf32>
    tpu.vector_store %arg9[%c0_52, %c0_53], %96 {strides = array<i32>} : memref<8x128xf32, #tpu.memory_space<vmem>>, vector<8x128xf32>,
    %c0_54 = arith.constant 0 : index
    %c0_55 = arith.constant 0 : index
    %100 = vector.load %arg8[%c0_54, %c0_55] : memref<8x128xf32, #tpu.memory_space<vmem>>, vector<8x128xf32>
    tpu.vector_store %arg8[%c0_54, %c0_55], %98 {strides = array<i32>} : memref<8x128xf32, #tpu.memory_space<vmem>>, vector<8x128xf32>,
    %c0_56 = arith.constant 0 : index
    %101 = arith.index_cast %c2_i32 : i32 to index
    %c0_57 = arith.constant 0 : index
    %c0_58 = arith.constant 0 : index
    %102 = vector.load %arg6[%c0_56, %101, %c0_57, %c0_58] : memref<1x4x8x128xf32, #tpu.memory_space<vmem>>, vector<1x1x8x128xf32>
    %103 = vector.shape_cast %102 : vector<1x1x8x128xf32> to vector<8x128xf32>
    %104 = vector.shape_cast %98 : vector<8x128xf32> to vector<1x1x8x128xf32>
    tpu.vector_store %arg6[%c0_56, %101, %c0_57, %c0_58], %104 {strides = array<i32>} : memref<1x4x8x128xf32, #tpu.memory_space<vmem>>, vector<1x1x8x128xf32>,
    %c3_i32 = arith.constant 3 : i32
    %c0_59 = arith.constant 0 : index
    %c0_60 = arith.constant 0 : index
    %105 = vector.load %arg8[%c0_59, %c0_60] : memref<8x128xf32, #tpu.memory_space<vmem>>, vector<8x128xf32>
    %c0_61 = arith.constant 0 : index
    %c0_62 = arith.constant 0 : index
    %106 = vector.load %arg9[%c0_61, %c0_62] : memref<8x128xf32, #tpu.memory_space<vmem>>, vector<8x128xf32>
    %c8_i32_63 = arith.constant 8 : i32
    %107 = arith.muli %c3_i32, %c8_i32_63 : i32
    %108 = tpu.assume_multiple %107, 8 : i32
    %109 = arith.index_cast %108 : i32 to index
    %c0_64 = arith.constant 0 : index
    %110 = vector.load %arg7[%109, %c0_64] : memref<32x512xf32, #tpu.memory_space<vmem>>, vector<8x512xf32>
    %cst_65 = arith.constant dense<0.000000e+00> : vector<8x512xf32>
    %111 = tpu.matmul %105, %14, %cst_65 {dimension_numbers = #tpu.dot_dimension_numbers<[1], [0], [0], [1], [0, 0, 1, 1], [], []>} : vector<8x128xf32>, vector<128x512xf32>, vector<8x512xf32> -> vector<8x512xf32>
    %112 = arith.addf %110, %111 : vector<8x512xf32>
    %113 = vector.extract_strided_slice %112 {offsets = [0, 0], sizes = [8, 384], strides = [1, 1]} : vector<8x512xf32> to vector<8x384xf32>
    %114 = arith.negf %113 : vector<8x384xf32>
    %115 = math.exp %114 : vector<8x384xf32>
    %cst_66 = arith.constant 1.000000e+00 : f32
    %116 = vector.broadcast %cst_66 : f32 to vector<8x384xf32>
    %117 = arith.addf %116, %115 : vector<8x384xf32>
    %118 = arith.divf %116, %117 : vector<8x384xf32>
    %119 = vector.extract_strided_slice %118 {offsets = [0, 0], sizes = [8, 128], strides = [1, 1]} : vector<8x384xf32> to vector<8x128xf32>
    %120 = vector.extract_strided_slice %118 {offsets = [0, 128], sizes = [8, 128], strides = [1, 1]} : vector<8x384xf32> to vector<8x128xf32>
    %121 = vector.extract_strided_slice %118 {offsets = [0, 256], sizes = [8, 128], strides = [1, 1]} : vector<8x384xf32> to vector<8x128xf32>
    %122 = vector.extract_strided_slice %112 {offsets = [0, 384], sizes = [8, 128], strides = [1, 1]} : vector<8x512xf32> to vector<8x128xf32>
    %123 = math.tanh %122 : vector<8x128xf32>
    %124 = arith.mulf %120, %106 : vector<8x128xf32>
    %125 = arith.mulf %119, %123 : vector<8x128xf32>
    %126 = arith.addf %124, %125 : vector<8x128xf32>
    %127 = math.tanh %126 : vector<8x128xf32>
    %128 = arith.mulf %121, %127 : vector<8x128xf32>
    %c0_67 = arith.constant 0 : index
    %c0_68 = arith.constant 0 : index
    %129 = vector.load %arg9[%c0_67, %c0_68] : memref<8x128xf32, #tpu.memory_space<vmem>>, vector<8x128xf32>
    tpu.vector_store %arg9[%c0_67, %c0_68], %126 {strides = array<i32>} : memref<8x128xf32, #tpu.memory_space<vmem>>, vector<8x128xf32>,
    %c0_69 = arith.constant 0 : index
    %c0_70 = arith.constant 0 : index
    %130 = vector.load %arg8[%c0_69, %c0_70] : memref<8x128xf32, #tpu.memory_space<vmem>>, vector<8x128xf32>
    tpu.vector_store %arg8[%c0_69, %c0_70], %128 {strides = array<i32>} : memref<8x128xf32, #tpu.memory_space<vmem>>, vector<8x128xf32>,
    %c0_71 = arith.constant 0 : index
    %131 = arith.index_cast %c3_i32 : i32 to index
    %c0_72 = arith.constant 0 : index
    %c0_73 = arith.constant 0 : index
    %132 = vector.load %arg6[%c0_71, %131, %c0_72, %c0_73] : memref<1x4x8x128xf32, #tpu.memory_space<vmem>>, vector<1x1x8x128xf32>
    %133 = vector.shape_cast %132 : vector<1x1x8x128xf32> to vector<8x128xf32>
    %134 = vector.shape_cast %128 : vector<8x128xf32> to vector<1x1x8x128xf32>
    tpu.vector_store %arg6[%c0_71, %131, %c0_72, %c0_73], %134 {strides = array<i32>} : memref<1x4x8x128xf32, #tpu.memory_space<vmem>>, vector<1x1x8x128xf32>,
    %c4_i32 = arith.constant 4 : i32
    return
  }
  func.func @transform_0(%arg0: i32, %arg1: i32) -> (i32, i32, i32) {
    %c0_i32 = arith.constant 0 : i32
    %c0_i32_0 = arith.constant 0 : i32
    return %arg0, %arg1, %c0_i32 : i32, i32, i32
  }
  func.func @transform_1(%arg0: i32, %arg1: i32) -> (i32, i32, i32) {
    %c0_i32 = arith.constant 0 : i32
    %c0_i32_0 = arith.constant 0 : i32
    %c0_i32_1 = arith.constant 0 : i32
    return %arg0, %c0_i32, %c0_i32_0 : i32, i32, i32
  }
  func.func @transform_2(%arg0: i32, %arg1: i32) -> (i32, i32, i32) {
    %c0_i32 = arith.constant 0 : i32
    %c0_i32_0 = arith.constant 0 : i32
    %c0_i32_1 = arith.constant 0 : i32
    return %arg0, %c0_i32, %c0_i32_0 : i32, i32, i32
  }
  func.func @transform_3(%arg0: i32, %arg1: i32) -> (i32, i32, i32) {
    %c0_i32 = arith.constant 0 : i32
    %c0_i32_0 = arith.constant 0 : i32
    %c0_i32_1 = arith.constant 0 : i32
    return %arg0, %c0_i32, %c0_i32_0 : i32, i32, i32
  }
  func.func @transform_4(%arg0: i32, %arg1: i32) -> (i32, i32, i32, i32) {
    %c0_i32 = arith.constant 0 : i32
    %c0_i32_0 = arith.constant 0 : i32
    %c0_i32_1 = arith.constant 0 : i32
    return %arg0, %arg1, %c0_i32, %c0_i32_0 : i32, i32, i32, i32
  }
}

</mosaic_0001>

<bundles_post_ra>
// kernel: rnn_forward.1
= control target key start
LH: loop header
LB: loop body
LE: loop exit
PB: predicated region body
PF: predicated region fallthrough
CT: control target
= control target key end

     0   :  { %s1531_s15 = smov 0   ;;  %s1533_s16 = smov 0   ;;  %s2124_s0 = inlined_call_operand.vmem [shape: f32[2,64,16], index: 0, kind: input, shape index: {}]   ;;  %s2125_s1 = inlined_call_operand.vmem [shape: f32[2,16,512], index: 1, kind: input, shape index: {}]   ;;  %s2126_s2 = inlined_call_operand.vmem [shape: f32[2,128,512], index: 2, kind: input, shape index: {}]   ;;  %s2127_s3 = inlined_call_operand.vmem [shape: f32[2,1,512], index: 3, kind: input, shape index: {}]   ;;  %s2128_s4 = inlined_call_operand.vmem [shape: f32[2,8,8,128], index: 4, kind: output, shape index: {}]  }
   0x1   :  { %s1535_s17 = smov 0   ;;  %s1537_s18 = smov 0  }
   0x2   :  { %s1539_s19 = smov 0  }
   0x3 LB: > { %s23_s20 = sadd.s32 1, %s1495_s17  ;;  %s26_s21 = sadd.s32 1, %s1499_s18  ;;  %s1503_s19 = sphi %s1539_s19, %s14_s19   ;;  %s1499_s18 = sphi %s1537_s18, %s2237_s18   ;;  %s1495_s17 = sphi %s1535_s17, %s2236_s17   ;;  %s1491_s16 = sphi %s1533_s16, %s2235_s16   ;;  %s1487_s15 = sphi %s1531_s15, %s2234_s15  }
   0x4   : > { %p24_p0 = scmp.ge.s32.totalorder %s23_s20, 2  ;;  %p1312_p1 = scmp.ge.s32.totalorder %s1503_s19, 1 }
   0x5   : > { %p212_p2 = scmp.lt.s32.totalorder %s1503_s19, 5 }
   0x6   : > { %s2239_s20 = smov (%p24_p0, %s23_s20), 0  ;;  %s2241_s21 = smov (!%p24_p0, %s26_s21), %s1499_s18 }
   0x7   : > { %p213_p3 = pnand %p1312_p1, %p212_p2  ;;  %p28_p4 = scmp.ge.s32.totalorder %s2241_s21, 2 }
   0x9   : > { %s2243_s21 = smov (%p28_p4, %s2241_s21), 0  ;;  %216 = sbr.rel (%p213_p3) target bundleno = 758 (0x2f6), region = 36 }
   0xe   : > { %s1313_s22 = sshll.u32 %s1487_s15, 2  ;;  %p261_p5 = scmp.lt.s32.totalorder %s1491_s16, 1 }
   0xf   : > { %p263_p6 = scmp.lt.s32.totalorder %s1313_s22, 7  ;;  %p1324_p7 = scmp.ne.s32.totalorder %s1487_s15, 0 }
  0x10   : > { %s2245_s16 = smov (!%p261_p5, %s1491_s16), 1 }
  0x11   : > { %s2247_s22 = smov (!%p263_p6, %s1313_s22), 7  ;;  %s1314_s23 = sshll.u32 %s2245_s16, 3 }
  0x12   : > { %s1358_s24 = sshll.u32 %s2245_s16, 6  ;;  %s266_s25 = sadd.s32 %s1314_s23, %s2247_s22 }
  0x13   : > { %s274_s28 = scalar_lea.vmem %s2125_s1, %s1358_s24  ;;  %s1315_s29 = sshll.u32 %s266_s25, 3 }
  0x14   : > { %s1359_s30 = sshll.u32 %s2245_s16, 9  ;;  %s1570_s7 = scalar_lea.vmem %s2124_s0, %s1315_s29 }
  0x15   : > { %s1575_s10 = scalar_lea.vmem %s2126_s2, %s1359_s30  ;;  %s1320_s11 = sshll.u32 %s2245_s16, 2 }
  0x16   : > { %s1580_s14 = scalar_lea.vmem %s2128_s4, %s1315_s29  ;;  %s1585_s24 = scalar_lea.vmem %s2127_s3, %s1320_s11 }
  0x17   : > { %297 = sbr.rel (%p1324_p7) target bundleno = 31 (0x1f), region = 40 }
  0x1c   : > { %v1505_v0 = vmov 0.0  }
  0x1d   : > { %298 = vst [vmem:[#allocation3] sm:$0xff] %v1505_v0 }
  0x1e   : > { %299 = vst [vmem:[#allocation4] sm:$0xff] %v1505_v0 }
  0x1f PF: > { %v308_v1 = vld [vmem:[%s274_s28 + $0x20] sm:$0xff]  ;;  %v309_v2 = vld [vmem:[%s274_s28 + $0x28] sm:$0xff]  ;;  %v310_v3 = vld [vmem:[%s274_s28 + $0x30] sm:$0xff]  ;;  %vm322_vm0 = vcmask 130048  }
  0x20   : > { %349 = vmatpush.msra.mxu0 %v308_v1  ;;  %378 = vmatpush.msra.mxu1 %v309_v2  ;;  %v311_v4 = vld [vmem:[%s274_s28 + $0x38] sm:$0xff]  ;;  %v304_v5 = vld [vmem:[%s274_s28] sm:$0xff]  ;;  %v305_v6 = vld [vmem:[%s274_s28 + $0x8] sm:$0xff] }
  0x21   : > { %407 = vmatpush.msra.mxu2 %v310_v3  ;;  %436 = vmatpush.msra.mxu3 %v311_v4  ;;  %v306_v7 = vld [vmem:[%s274_s28 + $0x10] sm:$0xff]  ;;  %v307_v8 = vld [vmem:[%s274_s28 + $0x18] sm:$0xff]  ;;  %v300_v9 = vld [vmem:[%s1570_s7] sm:$0xff] }
  0x22   : > { %350 = vmatpush.msra.mxu0 %v304_v5  ;;  %379 = vmatpush.msra.mxu1 %v305_v6  ;;  %v1590_v10 = vld [vmem:[%s1575_s10 + $0x1e0] sm:$0xff]  ;;  %v1593_v11 = vld [vmem:[%s1575_s10 + $0x1e8] sm:$0xff]  ;;  %v1598_v12 = vld [vmem:[%s1575_s10 + $0x1f0] sm:$0xff] }
  0x23   : > { %408 = vmatpush.msra.mxu2 %v306_v7  ;;  %437 = vmatpush.msra.mxu3 %v307_v8  ;;  %v1601_v13 = vld [vmem:[%s1575_s10 + $0x1f8] sm:$0xff]  ;;  %v1606_v14 = vld [vmem:[%s1575_s10 + $0x1c0] sm:$0xff]  ;;  %v1609_v15 = vld [vmem:[%s1575_s10 + $0x1c8] sm:$0xff] }
  0x24   : > { %1325 = vmatmul.msk.f32.vlgmr.msra.gmra.mxu0 %vm322_vm0, %v300_v9  ;;  %1329 = vmatmul.msk.f32.vlgmr.msra.gmra.mxu1 %vm322_vm0, %v300_v9  ;;  %v1614_v16 = vld [vmem:[%s1575_s10 + $0x1d0] sm:$0xff]  ;;  %v1617_v17 = vld [vmem:[%s1575_s10 + $0x1d8] sm:$0xff]  ;;  %v1622_v18 = vld [vmem:[%s1575_s10 + $0x1a0] sm:$0xff] }
  0x25   : > { %1333 = vmatmul.msk.f32.vlgmr.msra.gmra.mxu2 %vm322_vm0, %v300_v9  ;;  %1337 = vmatmul.msk.f32.vlgmr.msra.gmra.mxu3 %vm322_vm0, %v300_v9  ;;  %v1625_v19 = vld [vmem:[%s1575_s10 + $0x1a8] sm:$0xff]  ;;  %v1630_v20 = vld [vmem:[%s1575_s10 + $0x1b0] sm:$0xff]  ;;  %v1633_v21 = vld [vmem:[%s1575_s10 + $0x1b8] sm:$0xff] }
  0x26   : > { %540 = vmatpush.msrb.mxu0 %v1590_v10  ;;  %560 = vmatpush.msrb.mxu1 %v1593_v11  ;;  %v1638_v22 = vld [vmem:[%s1575_s10 + $0x180] sm:$0xff]  ;;  %v1641_v23 = vld [vmem:[%s1575_s10 + $0x188] sm:$0xff]  ;;  %v1646_v24 = vld [vmem:[%s1575_s10 + $0x190] sm:$0xff] }
  0x27   : > { %580 = vmatpush.msrb.mxu2 %v1598_v12  ;;  %600 = vmatpush.msrb.mxu3 %v1601_v13  ;;  %v1649_v25 = vld [vmem:[%s1575_s10 + $0x198] sm:$0xff]  ;;  %v301_v26 = vld [vmem:[%s1570_s7 + $0x8] sm:$0xff]  ;;  %v1659_v27 = vld [vmem:[%s1575_s10 + $0x160] sm:$0xff] }
  0x28   : > { %541 = vmatpush.msrb.mxu0 %v1606_v14  ;;  %561 = vmatpush.msrb.mxu1 %v1609_v15  ;;  %v1662_v28 = vld [vmem:[%s1575_s10 + $0x168] sm:$0xff]  ;;  %v1667_v29 = vld [vmem:[%s1575_s10 + $0x170] sm:$0xff]  ;;  %v1670_v30 = vld [vmem:[%s1575_s10 + $0x178] sm:$0xff] }
  0x29   : > { %581 = vmatpush.msrb.mxu2 %v1614_v16  ;;  %601 = vmatpush.msrb.mxu3 %v1617_v17  ;;  %v1675_v31 = vld [vmem:[%s1575_s10 + $0x140] sm:$0xff]  ;;  %v1678_v32 = vld [vmem:[%s1575_s10 + $0x148] sm:$0xff]  ;;  %v1683_v33 = vld [vmem:[%s1575_s10 + $0x150] sm:$0xff] }
  0x2a   : > { %542 = vmatpush.msrb.mxu0 %v1622_v18  ;;  %562 = vmatpush.msrb.mxu1 %v1625_v19  ;;  %v1686_v34 = vld [vmem:[%s1575_s10 + $0x158] sm:$0xff]  ;;  %v1691_v35 = vld [vmem:[%s1575_s10 + $0x120] sm:$0xff]  ;;  %v1694_v36 = vld [vmem:[%s1575_s10 + $0x128] sm:$0xff] }
  0x2b   : > { %582 = vmatpush.msrb.mxu2 %v1630_v20  ;;  %602 = vmatpush.msrb.mxu3 %v1633_v21  ;;  %v1699_v37 = vld [vmem:[%s1575_s10 + $0x130] sm:$0xff]  ;;  %v1702_v38 = vld [vmem:[%s1575_s10 + $0x138] sm:$0xff]  ;;  %v1707_v39 = vld [vmem:[%s1575_s10 + $0x100] sm:$0xff] }
  0x2c   : > { %543 = vmatpush.msrb.mxu0 %v1638_v22  ;;  %563 = vmatpush.msrb.mxu1 %v1641_v23  ;;  %v1710_v40 = vld [vmem:[%s1575_s10 + $0x108] sm:$0xff]  ;;  %v1715_v41 = vld [vmem:[%s1575_s10 + $0x110] sm:$0xff]  ;;  %v1718_v42 = vld [vmem:[%s1575_s10 + $0x118] sm:$0xff] }
  0x2d   : > { %583 = vmatpush.msrb.mxu2 %v1646_v24  ;;  %603 = vmatpush.msrb.mxu3 %v1649_v25  ;;  %v302_v43 = vld [vmem:[%s1570_s7 + $0x10] sm:$0xff]  ;;  %v1728_v44 = vld [vmem:[%s1575_s10 + $0xe0] sm:$0xff]  ;;  %v1731_v45 = vld [vmem:[%s1575_s10 + $0xe8] sm:$0xff] }
  0x2e   : > { %1326 = vmatmul.msk.f32.gmra.mxu0 %vm322_vm0, %v301_v26  ;;  %1330 = vmatmul.msk.f32.gmra.mxu1 %vm322_vm0, %v301_v26  ;;  %v1736_v46 = vld [vmem:[%s1575_s10 + $0xf0] sm:$0xff]  ;;  %v1739_v47 = vld [vmem:[%s1575_s10 + $0xf8] sm:$0xff]  ;;  %v1744_v48 = vld [vmem:[%s1575_s10 + $0xc0] sm:$0xff] }
  0x2f   : > { %1334 = vmatmul.msk.f32.gmra.mxu2 %vm322_vm0, %v301_v26  ;;  %1338 = vmatmul.msk.f32.gmra.mxu3 %vm322_vm0, %v301_v26  ;;  %v1747_v49 = vld [vmem:[%s1575_s10 + $0xc8] sm:$0xff]  ;;  %v1752_v50 = vld [vmem:[%s1575_s10 + $0xd0] sm:$0xff]  ;;  %v1755_v51 = vld [vmem:[%s1575_s10 + $0xd8] sm:$0xff] }
  0x30   : > { %544 = vmatpush.msrb.mxu0 %v1659_v27  ;;  %564 = vmatpush.msrb.mxu1 %v1662_v28  ;;  %2157 = vst [vmem:[#allocation5_spill] sm:$0xff] %v1752_v50  ;;  %v1760_v52 = vld [vmem:[%s1575_s10 + $0xa0] sm:$0xff]  ;;  %v1763_v53 = vld [vmem:[%s1575_s10 + $0xa8] sm:$0xff]  ;;  %v1768_v54 = vld [vmem:[%s1575_s10 + $0xb0] sm:$0xff] }
  0x31   : > { %584 = vmatpush.msrb.mxu2 %v1667_v29  ;;  %604 = vmatpush.msrb.mxu3 %v1670_v30  ;;  %2158 = vst [vmem:[#allocation6_spill] sm:$0xff] %v1755_v51  ;;  %v1771_v55 = vld [vmem:[%s1575_s10 + $0xb8] sm:$0xff]  ;;  %v1776_v56 = vld [vmem:[%s1575_s10 + $0x80] sm:$0xff]  ;;  %v1779_v57 = vld [vmem:[%s1575_s10 + $0x88] sm:$0xff] }
  0x32   : > { %545 = vmatpush.msrb.mxu0 %v1675_v31  ;;  %565 = vmatpush.msrb.mxu1 %v1678_v32  ;;  %2159 = vst [vmem:[#allocation7_spill] sm:$0xff] %v1760_v52  ;;  %v1784_v58 = vld [vmem:[%s1575_s10 + $0x90] sm:$0xff]  ;;  %v1787_v59 = vld [vmem:[%s1575_s10 + $0x98] sm:$0xff]  ;;  %v1797_v61 = vld [vmem:[%s1575_s10 + $0x60] sm:$0xff] }
  0x33   : > { %585 = vmatpush.msrb.mxu2 %v1683_v33  ;;  %605 = vmatpush.msrb.mxu3 %v1686_v34  ;;  %2160 = vst [vmem:[#allocation8_spill] sm:$0xff] %v1763_v53  ;;  %v303_v60 = vld [vmem:[%s1570_s7 + $0x18] sm:$0xff]  ;;  %v1800_v62 = vld [vmem:[%s1575_s10 + $0x68] sm:$0xff]  ;;  %v1805_v63 = vld [vmem:[%s1575_s10 + $0x70] sm:$0xff] }
  0x34   : > { %546 = vmatpush.msrb.mxu0 %v1691_v35  ;;  %566 = vmatpush.msrb.mxu1 %v1694_v36  ;;  %2161 = vst [vmem:[#allocation9_spill] sm:$0xff] %v1768_v54  ;;  %v1808_v0 = vld [vmem:[%s1575_s10 + $0x78] sm:$0xff]  ;;  %v1813_v1 = vld [vmem:[%s1575_s10 + $0x40] sm:$0xff]  ;;  %v1816_v2 = vld [vmem:[%s1575_s10 + $0x48] sm:$0xff] }
  0x35   : > { %586 = vmatpush.msrb.mxu2 %v1699_v37  ;;  %606 = vmatpush.msrb.mxu3 %v1702_v38  ;;  %2162 = vst [vmem:[#allocation10_spill] sm:$0xff] %v1771_v55  ;;  %v1821_v3 = vld [vmem:[%s1575_s10 + $0x50] sm:$0xff]  ;;  %v1824_v4 = vld [vmem:[%s1575_s10 + $0x58] sm:$0xff]  ;;  %v1829_v5 = vld [vmem:[%s1575_s10 + $0x20] sm:$0xff] }
  0x36   : > { %547 = vmatpush.msrb.mxu0 %v1707_v39  ;;  %567 = vmatpush.msrb.mxu1 %v1710_v40  ;;  %2163 = vst [vmem:[#allocation11_spill] sm:$0xff] %v1776_v56  ;;  %v1832_v6 = vld [vmem:[%s1575_s10 + $0x28] sm:$0xff]  ;;  %v1837_v7 = vld [vmem:[%s1575_s10 + $0x30] sm:$0xff]  ;;  %v1840_v8 = vld [vmem:[%s1575_s10 + $0x38] sm:$0xff] }
  0x37   : > { %587 = vmatpush.msrb.mxu2 %v1715_v41  ;;  %607 = vmatpush.msrb.mxu3 %v1718_v42  ;;  %2164 = vst [vmem:[#allocation12_spill] sm:$0xff] %v1779_v57  ;;  %v1845_v9 = vld [vmem:[%s1575_s10] sm:$0xff]  ;;  %v1848_v26 = vld [vmem:[%s1575_s10 + $0x8] sm:$0xff] }
  0x38   : > { %1327 = vmatmul.msk.f32.gmra.mxu0 %vm322_vm0, %v302_v43  ;;  %1331 = vmatmul.msk.f32.gmra.mxu1 %vm322_vm0, %v302_v43  ;;  %2165 = vst [vmem:[#allocation13_spill] sm:$0xff] %v1784_v58 }
  0x39   : > { %1335 = vmatmul.msk.f32.gmra.mxu2 %vm322_vm0, %v302_v43  ;;  %1339 = vmatmul.msk.f32.gmra.mxu3 %vm322_vm0, %v302_v43  ;;  %2166 = vst [vmem:[#allocation14_spill] sm:$0xff] %v1787_v59  ;;  %v1853_v43 = vld [vmem:[%s1575_s10 + $0x10] sm:$0xff] }
  0x3a   : > { %548 = vmatpush.msrb.mxu0 %v1728_v44  ;;  %568 = vmatpush.msrb.mxu1 %v1731_v45  ;;  %2167 = vst [vmem:[#allocation15_spill] sm:$0xff] %v1797_v61 }
  0x3b   : > { %588 = vmatpush.msrb.mxu2 %v1736_v46  ;;  %608 = vmatpush.msrb.mxu3 %v1739_v47  ;;  %2168 = vst [vmem:[#allocation16_spill] sm:$0xff] %v1800_v62 }
  0x3c   : > { %549 = vmatpush.msrb.mxu0 %v1744_v48  ;;  %569 = vmatpush.msrb.mxu1 %v1747_v49  ;;  %2169 = vst [vmem:[#allocation17_spill] sm:$0xff] %v1805_v63 }
  0x3d   : > { %589 = vmatpush.msrb.mxu2 %v1752_v50  ;;  %609 = vmatpush.msrb.mxu3 %v1755_v51  ;;  %2170 = vst [vmem:[#allocation18_spill] sm:$0xff] %v1808_v0 }
  0x3e   : > { %550 = vmatpush.msrb.mxu0 %v1760_v52  ;;  %570 = vmatpush.msrb.mxu1 %v1763_v53  ;;  %2171 = vst [vmem:[#allocation19_spill] sm:$0xff] %v1813_v1 }
  0x3f   : > { %590 = vmatpush.msrb.mxu2 %v1768_v54  ;;  %610 = vmatpush.msrb.mxu3 %v1771_v55  ;;  %2172 = vst [vmem:[#allocation20_spill] sm:$0xff] %v1816_v2 }
  0x40   : > { %551 = vmatpush.msrb.mxu0 %v1776_v56  ;;  %571 = vmatpush.msrb.mxu1 %v1779_v57  ;;  %2173 = vst [vmem:[#allocation21_spill] sm:$0xff] %v1821_v3 }
  0x41   : > { %591 = vmatpush.msrb.mxu2 %v1784_v58  ;;  %611 = vmatpush.msrb.mxu3 %v1787_v59  ;;  %2174 = vst [vmem:[#allocation22_spill] sm:$0xff] %v1824_v4 }
  0x42   : > { %1328 = vmatmul.msk.f32.gmra.mxu0 %vm322_vm0, %v303_v60  ;;  %1332 = vmatmul.msk.f32.gmra.mxu1 %vm322_vm0, %v303_v60  ;;  %2175 = vst [vmem:[#allocation23_spill] sm:$0xff] %v1829_v5 }
  0x43   : > { %1336 = vmatmul.msk.f32.gmra.mxu2 %vm322_vm0, %v303_v60  ;;  %1340 = vmatmul.msk.f32.gmra.mxu3 %vm322_vm0, %v303_v60  ;;  %2176 = vst [vmem:[#allocation24_spill] sm:$0xff] %v1832_v6  ;;  %v1856_v60 = vld [vmem:[%s1575_s10 + $0x18] sm:$0xff] }
  0x44   : > { %552 = vmatpush.msrb.mxu0 %v1797_v61  ;;  %572 = vmatpush.msrb.mxu1 %v1800_v62  ;;  %2177 = vst [vmem:[#allocation25_spill] sm:$0xff] %v1837_v7 }
  0x45   : > { %592 = vmatpush.msrb.mxu2 %v1805_v63  ;;  %612 = vmatpush.msrb.mxu3 %v1808_v0  ;;  %2178 = vst [vmem:[#allocation26_spill] sm:$0xff] %v1840_v8 }
  0x46   : > { %553 = vmatpush.msrb.mxu0 %v1813_v1  ;;  %573 = vmatpush.msrb.mxu1 %v1816_v2  ;;  %2179 = vst [vmem:[#allocation27_spill] sm:$0xff] %v1845_v9  ;;  %v531_v2 = vld [vmem:[#allocation3] sm:$0xff] }
  0x47   : > { %593 = vmatpush.msrb.mxu2 %v1821_v3  ;;  %613 = vmatpush.msrb.mxu3 %v1824_v4  ;;  %2180 = vst [vmem:[#allocation28_spill] sm:$0xff] %v1848_v26 }
  0x48   : > { %554 = vmatpush.msrb.mxu0 %v1829_v5  ;;  %574 = vmatpush.msrb.mxu1 %v1832_v6  ;;  %2181 = vst [vmem:[#allocation29_spill] sm:$0xff] %v1853_v43 }
  0x49   : > { %2182 = vst [vmem:[#allocation30_spill] sm:$0xff] %v1856_v60  ;;  %594 = vmatpush.msrb.mxu2 %v1837_v7  ;;  %614 = vmatpush.msrb.mxu3 %v1840_v8 }
  0x4a   : > { %555 = vmatpush.msrb.mxu0 %v1845_v9  ;;  %575 = vmatpush.msrb.mxu1 %v1848_v26 }
  0x4b   : > { %595 = vmatpush.msrb.mxu2 %v1853_v43  ;;  %615 = vmatpush.msrb.mxu3 %v1856_v60 }
  0x4c   : > { %556 = vmatmul.f32.vlgmr.msrb.gmra.mxu0 %v531_v2  ;;  %576 = vmatmul.f32.vlgmr.msrb.gmra.mxu1 %v531_v2 }
  0x4d   : > { %596 = vmatmul.f32.vlgmr.msrb.gmra.mxu2 %v531_v2  ;;  %616 = vmatmul.f32.vlgmr.msrb.gmra.mxu3 %v531_v2  ;;  %v2183_v2 = vld [vmem:[#allocation20_spill] sm:$0xff] }
  0x4e   : > { %699 = vmatpush.msra.mxu0 %v1590_v10  ;;  %719 = vmatpush.msra.mxu1 %v1593_v11 }
  0x4f   : > { %739 = vmatpush.msra.mxu2 %v1598_v12  ;;  %759 = vmatpush.msra.mxu3 %v1601_v13 }
  0x50   : > { %700 = vmatpush.msra.mxu0 %v1606_v14  ;;  %720 = vmatpush.msra.mxu1 %v1609_v15 }
  0x51   : > { %740 = vmatpush.msra.mxu2 %v1614_v16  ;;  %760 = vmatpush.msra.mxu3 %v1617_v17 }
  0x52   : > { %701 = vmatpush.msra.mxu0 %v1622_v18  ;;  %721 = vmatpush.msra.mxu1 %v1625_v19 }
  0x53   : > { %741 = vmatpush.msra.mxu2 %v1630_v20  ;;  %761 = vmatpush.msra.mxu3 %v1633_v21 }
  0x54   : > { %702 = vmatpush.msra.mxu0 %v1638_v22  ;;  %722 = vmatpush.msra.mxu1 %v1641_v23 }
  0x55   : > { %742 = vmatpush.msra.mxu2 %v1646_v24  ;;  %762 = vmatpush.msra.mxu3 %v1649_v25 }
  0x56   : > { %703 = vmatpush.msra.mxu0 %v1659_v27  ;;  %723 = vmatpush.msra.mxu1 %v1662_v28 }
  0x57   : > { %743 = vmatpush.msra.mxu2 %v1667_v29  ;;  %763 = vmatpush.msra.mxu3 %v1670_v30 }
  0x58   : > { %704 = vmatpush.msra.mxu0 %v1675_v31  ;;  %724 = vmatpush.msra.mxu1 %v1678_v32 }
  0x59   : > { %744 = vmatpush.msra.mxu2 %v1683_v33  ;;  %764 = vmatpush.msra.mxu3 %v1686_v34 }
  0x5a   : > { %705 = vmatpush.msra.mxu0 %v1691_v35  ;;  %725 = vmatpush.msra.mxu1 %v1694_v36 }
  0x5b   : > { %745 = vmatpush.msra.mxu2 %v1699_v37  ;;  %765 = vmatpush.msra.mxu3 %v1702_v38 }
  0x5c   : > { %706 = vmatpush.msra.mxu0 %v1707_v39  ;;  %726 = vmatpush.msra.mxu1 %v1710_v40 }
  0x5d   : > { %746 = vmatpush.msra.mxu2 %v1715_v41  ;;  %766 = vmatpush.msra.mxu3 %v1718_v42 }
  0x5e   : > { %707 = vmatpush.msra.mxu0 %v1728_v44  ;;  %727 = vmatpush.msra.mxu1 %v1731_v45 }
  0x5f   : > { %747 = vmatpush.msra.mxu2 %v1736_v46  ;;  %767 = vmatpush.msra.mxu3 %v1739_v47 }
  0x60   : > { %708 = vmatpush.msra.mxu0 %v1744_v48  ;;  %728 = vmatpush.msra.mxu1 %v1747_v49 }
  0x61   : > { %748 = vmatpush.msra.mxu2 %v1752_v50  ;;  %768 = vmatpush.msra.mxu3 %v1755_v51 }
  0x62   : > { %709 = vmatpush.msra.mxu0 %v1760_v52  ;;  %729 = vmatpush.msra.mxu1 %v1763_v53 }
  0x63   : > { %749 = vmatpush.msra.mxu2 %v1768_v54  ;;  %769 = vmatpush.msra.mxu3 %v1771_v55 }
  0x64   : > { %710 = vmatpush.msra.mxu0 %v1776_v56  ;;  %730 = vmatpush.msra.mxu1 %v1779_v57 }
  0x65   : > { %750 = vmatpush.msra.mxu2 %v1784_v58  ;;  %770 = vmatpush.msra.mxu3 %v1787_v59 }
  0x66   : > { %711 = vmatpush.msra.mxu0 %v1797_v61  ;;  %731 = vmatpush.msra.mxu1 %v1800_v62 }
  0x67   : > { %751 = vmatpush.msra.mxu2 %v1805_v63  ;;  %771 = vmatpush.msra.mxu3 %v1808_v0 }
  0x68   : > { %712 = vmatpush.msra.mxu0 %v1813_v1  ;;  %732 = vmatpush.msra.mxu1 %v2183_v2 }
  0x69   : > { %752 = vmatpush.msra.mxu2 %v1821_v3  ;;  %772 = vmatpush.msra.mxu3 %v1824_v4 }
  0x6a   : > { %713 = vmatpush.msra.mxu0 %v1829_v5  ;;  %733 = vmatpush.msra.mxu1 %v1832_v6 }
  0x6b   : > { %753 = vmatpush.msra.mxu2 %v1837_v7  ;;  %773 = vmatpush.msra.mxu3 %v1840_v8 }
  0x6c   : > { %714 = vmatpush.msra.mxu0 %v1845_v9  ;;  %734 = vmatpush.msra.mxu1 %v1848_v26 }
  0x6d   : > { %754 = vmatpush.msra.mxu2 %v1853_v43  ;;  %774 = vmatpush.msra.mxu3 %v1856_v60 }
  0x6e   : > { %859 = vmatpush.msrb.mxu0 %v1590_v10  ;;  %879 = vmatpush.msrb.mxu1 %v1593_v11 }
  0x6f   : > { %899 = vmatpush.msrb.mxu2 %v1598_v12  ;;  %919 = vmatpush.msrb.mxu3 %v1601_v13 }
  0x70   : > { %860 = vmatpush.msrb.mxu0 %v1606_v14  ;;  %880 = vmatpush.msrb.mxu1 %v1609_v15 }
  0x71   : > { %900 = vmatpush.msrb.mxu2 %v1614_v16  ;;  %920 = vmatpush.msrb.mxu3 %v1617_v17 }
  0x72   : > { %861 = vmatpush.msrb.mxu0 %v1622_v18  ;;  %881 = vmatpush.msrb.mxu1 %v1625_v19 }
  0x73   : > { %901 = vmatpush.msrb.mxu2 %v1630_v20  ;;  %921 = vmatpush.msrb.mxu3 %v1633_v21 }
  0x74   : > { %862 = vmatpush.msrb.mxu0 %v1638_v22  ;;  %882 = vmatpush.msrb.mxu1 %v1641_v23 }
  0x75   : > { %902 = vmatpush.msrb.mxu2 %v1646_v24  ;;  %922 = vmatpush.msrb.mxu3 %v1649_v25 }
  0x76   : > { %863 = vmatpush.msrb.mxu0 %v1659_v27  ;;  %883 = vmatpush.msrb.mxu1 %v1662_v28 }
  0x77   : > { %903 = vmatpush.msrb.mxu2 %v1667_v29  ;;  %923 = vmatpush.msrb.mxu3 %v1670_v30 }
  0x78   : > { %864 = vmatpush.msrb.mxu0 %v1675_v31  ;;  %884 = vmatpush.msrb.mxu1 %v1678_v32 }
  0x79   : > { %904 = vmatpush.msrb.mxu2 %v1683_v33  ;;  %924 = vmatpush.msrb.mxu3 %v1686_v34 }
  0x7a   : > { %865 = vmatpush.msrb.mxu0 %v1691_v35  ;;  %885 = vmatpush.msrb.mxu1 %v1694_v36 }
  0x7b   : > { %905 = vmatpush.msrb.mxu2 %v1699_v37  ;;  %925 = vmatpush.msrb.mxu3 %v1702_v38 }
  0x7c   : > { %866 = vmatpush.msrb.mxu0 %v1707_v39  ;;  %886 = vmatpush.msrb.mxu1 %v1710_v40 }
  0x7d   : > { %906 = vmatpush.msrb.mxu2 %v1715_v41  ;;  %926 = vmatpush.msrb.mxu3 %v1718_v42 }
  0x7e   : > { %867 = vmatpush.msrb.mxu0 %v1728_v44  ;;  %887 = vmatpush.msrb.mxu1 %v1731_v45 }
  0x7f   : > { %907 = vmatpush.msrb.mxu2 %v1736_v46  ;;  %927 = vmatpush.msrb.mxu3 %v1739_v47 }
  0x80   : > { %868 = vmatpush.msrb.mxu0 %v1744_v48  ;;  %888 = vmatpush.msrb.mxu1 %v1747_v49 }
  0x81   : > { %908 = vmatpush.msrb.mxu2 %v1752_v50  ;;  %928 = vmatpush.msrb.mxu3 %v1755_v51 }
  0x82   : > { %869 = vmatpush.msrb.mxu0 %v1760_v52  ;;  %889 = vmatpush.msrb.mxu1 %v1763_v53 }
  0x83   : > { %909 = vmatpush.msrb.mxu2 %v1768_v54  ;;  %929 = vmatpush.msrb.mxu3 %v1771_v55 }
  0x84   : > { %870 = vmatpush.msrb.mxu0 %v1776_v56  ;;  %890 = vmatpush.msrb.mxu1 %v1779_v57 }
  0x85   : > { %910 = vmatpush.msrb.mxu2 %v1784_v58  ;;  %930 = vmatpush.msrb.mxu3 %v1787_v59 }
  0x86   : > { %871 = vmatpush.msrb.mxu0 %v1797_v61  ;;  %891 = vmatpush.msrb.mxu1 %v1800_v62 }
  0x87   : > { %911 = vmatpush.msrb.mxu2 %v1805_v63  ;;  %931 = vmatpush.msrb.mxu3 %v1808_v0 }
  0x88   : > { %872 = vmatpush.msrb.mxu0 %v1813_v1  ;;  %892 = vmatpush.msrb.mxu1 %v2183_v2  ;;  %v312_v1 = vld [vmem:[%s1585_s24] sm:$0xf] }
  0x89   : > { %912 = vmatpush.msrb.mxu2 %v1821_v3  ;;  %932 = vmatpush.msrb.mxu3 %v1824_v4  ;;  %v315_v63 = vperm.slane %v312_v1, 1  ;;  %v317_v61 = vperm.slane %v312_v1, 3 }
  0x8a   : > { %873 = vmatpush.msrb.mxu0 %v1829_v5  ;;  %893 = vmatpush.msrb.mxu1 %v1832_v6  ;;  %v314_v5 = vperm.slane %v312_v1, 0 }
  0x8b   : > { %913 = vmatpush.msrb.mxu2 %v1837_v7  ;;  %933 = vmatpush.msrb.mxu3 %v1840_v8 }
  0x8c   : > { %874 = vmatpush.msrb.mxu0 %v1845_v9  ;;  %894 = vmatpush.msrb.mxu1 %v1848_v26  ;;  %v316_v9 = vperm.slane %v312_v1, 2 }
  0x8d   : > { %914 = vmatpush.msrb.mxu2 %v1853_v43  ;;  %934 = vmatpush.msrb.mxu3 %v1856_v60 }
  0xa1   : > { %v352_v2 = vpop.f32.mrf.mxu0  ;;  %v381_v3 = vpop.f32.mrf.mxu1 }
  0xa8   : > { %v410_v4 = vpop.f32.mrf.mxu2  ;;  %v439_v0 = vpop.f32.mrf.mxu3 }
  0xa9   : > { %v411_v51 = vadd.f32 %v410_v4, %v316_v9 }
  0xab   : > { %v355_v6 = vpop.f32.mrf.mxu0  ;;  %v384_v62 = vpop.f32.mrf.mxu1 }
  0xac   : > { %v1993_v7 = vadd.f32 %v355_v6, %v314_v5  ;;  %v1995_v8 = vadd.f32 %v384_v62, %v315_v63 }
  0xae   : > { %2184 = vst [vmem:[#allocation31_spill] sm:$0xff] %v1993_v7 }
  0xaf   : > { %2185 = vst [vmem:[#allocation32_spill] sm:$0xff] %v1995_v8 }
  0xb2   : > { %v413_v26 = vpop.f32.mrf.mxu2  ;;  %v442_v59 = vpop.f32.mrf.mxu3 }
  0xb3   : > { %v1997_v43 = vadd.f32 %v413_v26, %v316_v9  ;;  %v1999_v60 = vadd.f32 %v442_v59, %v317_v61 }
  0xb5   : > { %2186 = vst [vmem:[#allocation33_spill] sm:$0xff] %v1997_v43  ;;  %v358_v58 = vpop.f32.mrf.mxu0  ;;  %v387_v57 = vpop.f32.mrf.mxu1 }
  0xb6   : > { %2187 = vst [vmem:[#allocation34_spill] sm:$0xff] %v1999_v60  ;;  %v2001_v56 = vadd.f32 %v358_v58, %v314_v5  ;;  %v2003_v55 = vadd.f32 %v387_v57, %v315_v63  ;;  %v353_v57 = vadd.f32 %v352_v2, %v314_v5 }
  0xb8   : > { %2188 = vst [vmem:[#allocation35_spill] sm:$0xff] %v2001_v56 }
  0xb9   : > { %2189 = vst [vmem:[#allocation36_spill] sm:$0xff] %v2003_v55  ;;  %v382_v55 = vadd.f32 %v381_v3, %v315_v63 }
  0xbc   : > { %v416_v54 = vpop.f32.mrf.mxu2  ;;  %v445_v53 = vpop.f32.mrf.mxu3 }
  0xbd   : > { %v2005_v6 = vadd.f32 %v416_v54, %v316_v9  ;;  %v2007_v62 = vadd.f32 %v445_v53, %v317_v61 }
  0xbf   : > { %2190 = vst [vmem:[#allocation37_spill] sm:$0xff] %v2005_v6  ;;  %v361_v8 = vpop.f32.mrf.mxu0  ;;  %v390_v1 = vpop.f32.mrf.mxu1 }
  0xc0   : > { %2191 = vst [vmem:[#allocation38_spill] sm:$0xff] %v2007_v62  ;;  %v2009_v7 = vadd.f32 %v361_v8, %v314_v5  ;;  %v2011_v26 = vadd.f32 %v390_v1, %v315_v63  ;;  %v440_v5 = vadd.f32 %v439_v0, %v317_v61 }
  0xc2   : > { %2192 = vst [vmem:[#allocation39_spill] sm:$0xff] %v2009_v7 }
  0xc3   : > { %2193 = vst [vmem:[#allocation40_spill] sm:$0xff] %v2011_v26 }
  0xc6   : > { %v419_v59 = vpop.f32.mrf.mxu2  ;;  %v448_v60 = vpop.f32.mrf.mxu3 }
  0xc7   : > { %v2013_v43 = vadd.f32 %v419_v59, %v316_v9  ;;  %v2015_v58 = vadd.f32 %v448_v60, %v317_v61 }
  0xc9   : > { %2194 = vst [vmem:[#allocation41_spill] sm:$0xff] %v2013_v43  ;;  %v557_v56 = vpop.f32.mrf.mxu0  ;;  %v577_v52 = vpop.f32.mrf.mxu1 }
  0xca   : > { %2195 = vst [vmem:[#allocation42_spill] sm:$0xff] %v2015_v58  ;;  %v620_v54 = vadd.f32 %v557_v56, %v353_v57  ;;  %v621_v6 = vadd.f32 %v577_v52, %v382_v55 }
  0xcc   : > { %v1341_v53 = vmul.f32 -1.442695, %v620_v54  ;;  %v1342_v62 = vmul.f32 -1.442695, %v621_v6 }
  0xce   : > { %1401 = vpow2.f32 %v1341_v53 }
  0xcf   : > { %1403 = vpow2.f32 %v1342_v62 }
  0xd0   : > { %v597_v8 = vpop.f32.mrf.mxu2  ;;  %v617_v63 = vpop.f32.mrf.mxu3 }
  0xd1   : > { %v622_v1 = vadd.f32 %v597_v8, %v411_v51  ;;  %v623_v55 = vadd.f32 %v617_v63, %v440_v5 }
  0xd3   : > { %v1343_v26 = vmul.f32 -1.442695, %v622_v1 }
  0xd4   : > { %v1402_v7 = vpop.eup %1401 }
  0xd5   : > { %v1404_v50 = vpop.eup %1403  ;;  %v633_v59 = vadd.f32 1.0, %v1402_v7  ;;  %1405 = vpow2.f32 %v1343_v26 }
  0xd6   : > { %v634_v60 = vadd.f32 1.0, %v1404_v50 }
  0xd7   : > { %1407 = vrcp.f32 %v633_v59  ;;  %v647_v62 = vand.u32 2147483648, %v633_v59  ;;  %v645_v50 = vand.u32 2147483647, %v633_v59  ;;  %vm641_vm3 = vweird.f32 %v633_v59 }
  0xd8   : > { %1409 = vrcp.f32 %v634_v60  ;;  %v662_v57 = vand.u32 2147483648, %v634_v60  ;;  %v660_v54 = vand.u32 2147483647, %v634_v60  ;;  %vm656_vm4 = vweird.f32 %v634_v60 }
  0xd9   : > { %v648_v8 = vor.u32 1.1754944e-38, %v647_v62  ;;  %vm646_vm7 = vcmp.eq.f32.partialorder %v645_v50, 8.507059e+37 }
  0xda   : > { %v663_v63 = vor.u32 1.1754944e-38, %v662_v57  ;;  %vm661_vm8 = vcmp.eq.f32.partialorder %v660_v54, 8.507059e+37 }
  0xdb   : > { %v1406_v3 = vpop.eup %1405 }
  0xdc   : > { %v635_v56 = vadd.f32 1.0, %v1406_v3  ;;  %v532_v3 = vld [vmem:[#allocation4] sm:$0xff] }
  0xdd   : > { %v1408_v52 = vpop.eup %1407 }
  0xde   : > { %v1410_v2 = vpop.eup %1409  ;;  %v637_v6 = vmul.f32 %v1408_v52, %v633_v59  ;;  %1411 = vrcp.f32 %v635_v56  ;;  %vm642_vm1 = vweird.f32 %v1408_v52  ;;  %v677_v62 = vand.u32 2147483648, %v635_v56 }
  0xdf   : > { %v652_v4 = vmul.f32 %v1410_v2, %v634_v60  ;;  %1413 = vtanh.f32 %v623_v55  ;;  %vm657_vm2 = vweird.f32 %v1410_v2  ;;  %vm643_vm5 = vmor %vm641_vm3, %vm642_vm1  ;;  %vm671_vm10 = vweird.f32 %v635_v56 }
  0xe0   : > { %v638_v9 = vsub.f32 1.0, %v637_v6  ;;  %vm658_vm6 = vmor %vm656_vm4, %vm657_vm2  ;;  %v678_v50 = vor.u32 1.1754944e-38, %v677_v62 }
  0xe1   : > { %v653_v51 = vsub.f32 1.0, %v652_v4 }
  0xe2   : > { %v639_v7 = vmul.f32 %v1408_v52, %v638_v9 }
  0xe3   : > { %v654_v26 = vmul.f32 %v1410_v2, %v653_v51 }
  0xe4   : > { %v1412_v53 = vpop.eup %1411  ;;  %v640_v61 = vadd.f32 %v1408_v52, %v639_v7 }
  0xe5   : > { %v667_v0 = vmul.f32 %v1412_v53, %v635_v56  ;;  %v655_v1 = vadd.f32 %v1410_v2, %v654_v26  ;;  %v1414_v55 = vpop.eup %1413  ;;  %vm672_vm9 = vweird.f32 %v1412_v53 }
  0xe6   : > { %v644_v5 = vsel %vm643_vm5, %v1408_v52, %v640_v61  ;;  %v675_v52 = vand.u32 2147483647, %v635_v56  ;;  %vm673_vm11 = vmor %vm671_vm10, %vm672_vm9 }
  0xe7   : > { %v668_v6 = vsub.f32 1.0, %v667_v0  ;;  %v649_v4 = vsel %vm646_vm7, %v648_v8, %v644_v5  ;;  %v659_v9 = vsel %vm658_vm6, %v1410_v2, %v655_v1 }
  0xe8   : > { %v664_v51 = vsel %vm661_vm8, %v663_v63, %v659_v9  ;;  %v683_v58 = vmul.f32 %v1414_v55, %v649_v4  ;;  %vm676_vm12 = vcmp.eq.f32.partialorder %v675_v52, 8.507059e+37  ;;  %v2225_v63 = vld [vmem:[#allocation34_spill] sm:$0xff] }
  0xe9   : > { %v669_v43 = vmul.f32 %v1412_v53, %v668_v6  ;;  %v682_v59 = vmul.f32 %v664_v51, %v532_v3 }
  0xeb   : > { %v2017_v60 = vadd.f32 %v683_v58, %v682_v59  ;;  %v670_v7 = vadd.f32 %v1412_v53, %v669_v43 }
  0xed   : > { %1415 = vtanh.f32 %v2017_v60  ;;  %v674_v57 = vsel %vm673_vm11, %v1412_v53, %v670_v7 }
  0xee   : > { %v679_v26 = vsel %vm676_vm12, %v678_v50, %v674_v57 }
  0xf3   : > { %v1416_v2 = vpop.eup %1415 }
  0xf4   : > { %v686_v54 = vmul.f32 %v1416_v2, %v679_v26 }
  0xf6   : > { %689 = vst [vmem:[%s1580_s14] sm:$0xff] %v686_v54  ;;  %715 = vmatmul.f32.vlgmr.msra.gmra.mxu0 %v686_v54  ;;  %735 = vmatmul.f32.vlgmr.msra.gmra.mxu1 %v686_v54 }
  0xf7   : > { %755 = vmatmul.f32.vlgmr.msra.gmra.mxu2 %v686_v54  ;;  %775 = vmatmul.f32.vlgmr.msra.gmra.mxu3 %v686_v54 }
  0xf8   : > { %1019 = vmatpush.msra.mxu0 %v1590_v10  ;;  %1039 = vmatpush.msra.mxu1 %v1593_v11  ;;  %v2196_v10 = vld [vmem:[#allocation5_spill] sm:$0xff]  ;;  %v2197_v11 = vld [vmem:[#allocation6_spill] sm:$0xff] }
  0xf9   : > { %1059 = vmatpush.msra.mxu2 %v1598_v12  ;;  %1079 = vmatpush.msra.mxu3 %v1601_v13  ;;  %v2198_v12 = vld [vmem:[#allocation7_spill] sm:$0xff]  ;;  %v2199_v13 = vld [vmem:[#allocation8_spill] sm:$0xff] }
  0xfa   : > { %1020 = vmatpush.msra.mxu0 %v1606_v14  ;;  %1040 = vmatpush.msra.mxu1 %v1609_v15  ;;  %v2200_v14 = vld [vmem:[#allocation9_spill] sm:$0xff]  ;;  %v2201_v15 = vld [vmem:[#allocation10_spill] sm:$0xff] }
  0xfb   : > { %1060 = vmatpush.msra.mxu2 %v1614_v16  ;;  %1080 = vmatpush.msra.mxu3 %v1617_v17  ;;  %v2202_v16 = vld [vmem:[#allocation11_spill] sm:$0xff]  ;;  %v2203_v17 = vld [vmem:[#allocation12_spill] sm:$0xff] }
  0xfc   : > { %1021 = vmatpush.msra.mxu0 %v1622_v18  ;;  %1041 = vmatpush.msra.mxu1 %v1625_v19  ;;  %v2204_v18 = vld [vmem:[#allocation13_spill] sm:$0xff]  ;;  %v2205_v19 = vld [vmem:[#allocation14_spill] sm:$0xff] }
  0xfd   : > { %1061 = vmatpush.msra.mxu2 %v1630_v20  ;;  %1081 = vmatpush.msra.mxu3 %v1633_v21  ;;  %v2206_v20 = vld [vmem:[#allocation15_spill] sm:$0xff]  ;;  %v2207_v21 = vld [vmem:[#allocation16_spill] sm:$0xff] }
  0xfe   : > { %1022 = vmatpush.msra.mxu0 %v1638_v22  ;;  %1042 = vmatpush.msra.mxu1 %v1641_v23  ;;  %v2208_v22 = vld [vmem:[#allocation17_spill] sm:$0xff]  ;;  %v2209_v23 = vld [vmem:[#allocation18_spill] sm:$0xff] }
  0xff   : > { %1062 = vmatpush.msra.mxu2 %v1646_v24  ;;  %1082 = vmatpush.msra.mxu3 %v1649_v25  ;;  %v2210_v24 = vld [vmem:[#allocation19_spill] sm:$0xff]  ;;  %v2211_v25 = vld [vmem:[#allocation20_spill] sm:$0xff] }
 0x100   : > { %1023 = vmatpush.msra.mxu0 %v1659_v27  ;;  %1043 = vmatpush.msra.mxu1 %v1662_v28  ;;  %v2212_v27 = vld [vmem:[#allocation21_spill] sm:$0xff]  ;;  %v2213_v28 = vld [vmem:[#allocation22_spill] sm:$0xff] }
 0x101   : > { %1063 = vmatpush.msra.mxu2 %v1667_v29  ;;  %1083 = vmatpush.msra.mxu3 %v1670_v30  ;;  %v2214_v29 = vld [vmem:[#allocation23_spill] sm:$0xff]  ;;  %v2215_v30 = vld [vmem:[#allocation24_spill] sm:$0xff] }
 0x102   : > { %1024 = vmatpush.msra.mxu0 %v1675_v31  ;;  %1044 = vmatpush.msra.mxu1 %v1678_v32  ;;  %v2216_v31 = vld [vmem:[#allocation25_spill] sm:$0xff]  ;;  %v2217_v32 = vld [vmem:[#allocation26_spill] sm:$0xff] }
 0x103   : > { %1064 = vmatpush.msra.mxu2 %v1683_v33  ;;  %1084 = vmatpush.msra.mxu3 %v1686_v34  ;;  %v2218_v33 = vld [vmem:[#allocation27_spill] sm:$0xff]  ;;  %v2219_v34 = vld [vmem:[#allocation28_spill] sm:$0xff] }
 0x104   : > { %1025 = vmatpush.msra.mxu0 %v1691_v35  ;;  %1045 = vmatpush.msra.mxu1 %v1694_v36  ;;  %v2220_v35 = vld [vmem:[#allocation29_spill] sm:$0xff]  ;;  %v2221_v36 = vld [vmem:[#allocation30_spill] sm:$0xff] }
 0x105   : > { %1065 = vmatpush.msra.mxu2 %v1699_v37  ;;  %1085 = vmatpush.msra.mxu3 %v1702_v38 }
 0x106   : > { %1026 = vmatpush.msra.mxu0 %v1707_v39  ;;  %1046 = vmatpush.msra.mxu1 %v1710_v40  ;;  %v2222_v39 = vld [vmem:[#allocation31_spill] sm:$0xff] }
 0x107   : > { %1066 = vmatpush.msra.mxu2 %v1715_v41  ;;  %1086 = vmatpush.msra.mxu3 %v1718_v42  ;;  %v2223_v41 = vld [vmem:[#allocation32_spill] sm:$0xff] }
 0x108   : > { %1027 = vmatpush.msra.mxu0 %v1728_v44  ;;  %1047 = vmatpush.msra.mxu1 %v1731_v45 }
 0x109   : > { %1067 = vmatpush.msra.mxu2 %v1736_v46  ;;  %1087 = vmatpush.msra.mxu3 %v1739_v47  ;;  %v2224_v47 = vld [vmem:[#allocation33_spill] sm:$0xff] }
 0x10a   : > { %1028 = vmatpush.msra.mxu0 %v1744_v48  ;;  %1048 = vmatpush.msra.mxu1 %v1747_v49 }
 0x10b   : > { %1068 = vmatpush.msra.mxu2 %v2196_v10  ;;  %1088 = vmatpush.msra.mxu3 %v2197_v11 }
 0x10c   : > { %1029 = vmatpush.msra.mxu0 %v2198_v12  ;;  %1049 = vmatpush.msra.mxu1 %v2199_v13 }
 0x10d   : > { %1069 = vmatpush.msra.mxu2 %v2200_v14  ;;  %1089 = vmatpush.msra.mxu3 %v2201_v15 }
 0x10e   : > { %1030 = vmatpush.msra.mxu0 %v2202_v16  ;;  %1050 = vmatpush.msra.mxu1 %v2203_v17 }
 0x10f   : > { %1070 = vmatpush.msra.mxu2 %v2204_v18  ;;  %1090 = vmatpush.msra.mxu3 %v2205_v19 }
 0x110   : > { %1031 = vmatpush.msra.mxu0 %v2206_v20  ;;  %1051 = vmatpush.msra.mxu1 %v2207_v21 }
 0x111   : > { %1071 = vmatpush.msra.mxu2 %v2208_v22  ;;  %1091 = vmatpush.msra.mxu3 %v2209_v23 }
 0x112   : > { %1032 = vmatpush.msra.mxu0 %v2210_v24  ;;  %1052 = vmatpush.msra.mxu1 %v2211_v25 }
 0x113   : > { %1072 = vmatpush.msra.mxu2 %v2212_v27  ;;  %1092 = vmatpush.msra.mxu3 %v2213_v28 }
 0x114   : > { %1033 = vmatpush.msra.mxu0 %v2214_v29  ;;  %1053 = vmatpush.msra.mxu1 %v2215_v30 }
 0x115   : > { %1073 = vmatpush.msra.mxu2 %v2216_v31  ;;  %1093 = vmatpush.msra.mxu3 %v2217_v32  ;;  %v2226_v32 = vld [vmem:[#allocation35_spill] sm:$0xff] }
 0x116   : > { %1034 = vmatpush.msra.mxu0 %v2218_v33  ;;  %1054 = vmatpush.msra.mxu1 %v2219_v34  ;;  %v2227_v34 = vld [vmem:[#allocation36_spill] sm:$0xff] }
 0x117   : > { %1074 = vmatpush.msra.mxu2 %v2220_v35  ;;  %1094 = vmatpush.msra.mxu3 %v2221_v36 }
 0x173   : > { %v716_v37 = vpop.f32.mrf.mxu0  ;;  %v736_v38 = vpop.f32.mrf.mxu1 }
 0x174   : > { %v779_v40 = vadd.f32 %v716_v37, %v2222_v39  ;;  %v780_v42 = vadd.f32 %v736_v38, %v2223_v41  ;;  %v2228_v39 = vld [vmem:[#allocation37_spill] sm:$0xff] }
 0x176   : > { %v1344_v44 = vmul.f32 -1.442695, %v779_v40  ;;  %v1345_v45 = vmul.f32 -1.442695, %v780_v42 }
 0x178   : > { %1417 = vpow2.f32 %v1344_v44 }
 0x179   : > { %1419 = vpow2.f32 %v1345_v45 }
 0x17a   : > { %v756_v46 = vpop.f32.mrf.mxu2  ;;  %v776_v61 = vpop.f32.mrf.mxu3 }
 0x17b   : > { %v781_v48 = vadd.f32 %v756_v46, %v2224_v47  ;;  %v782_v3 = vadd.f32 %v776_v61, %v2225_v63 }
 0x17d   : > { %v1346_v49 = vmul.f32 -1.442695, %v781_v48 }
 0x17e   : > { %v1418_v43 = vpop.eup %1417 }
 0x17f   : > { %v1420_v58 = vpop.eup %1419  ;;  %v792_v56 = vadd.f32 1.0, %v1418_v43  ;;  %1421 = vpow2.f32 %v1346_v49 }
 0x180   : > { %v793_v53 = vadd.f32 1.0, %v1420_v58  ;;  %v2229_v58 = vld [vmem:[#allocation38_spill] sm:$0xff] }
 0x181   : > { %1423 = vrcp.f32 %v792_v56  ;;  %v806_v51 = vand.u32 2147483648, %v792_v56  ;;  %v804_v62 = vand.u32 2147483647, %v792_v56  ;;  %vm800_vm15 = vweird.f32 %v792_v56 }
 0x182   : > { %1425 = vrcp.f32 %v793_v53  ;;  %v821_v59 = vand.u32 2147483648, %v793_v53  ;;  %v819_v57 = vand.u32 2147483647, %v793_v53  ;;  %vm815_vm0 = vweird.f32 %v793_v53 }
 0x183   : > { %v807_v54 = vor.u32 1.1754944e-38, %v806_v51  ;;  %vm805_vm3 = vcmp.eq.f32.partialorder %v804_v62, 8.507059e+37 }
 0x184   : > { %v822_v11 = vor.u32 1.1754944e-38, %v821_v59  ;;  %vm820_vm4 = vcmp.eq.f32.partialorder %v819_v57, 8.507059e+37 }
 0x185   : > { %v1422_v0 = vpop.eup %1421 }
 0x186   : > { %v794_v8 = vadd.f32 1.0, %v1422_v0 }
 0x187   : > { %v1424_v1 = vpop.eup %1423 }
 0x188   : > { %v1426_v5 = vpop.eup %1425  ;;  %v796_v55 = vmul.f32 %v1424_v1, %v792_v56  ;;  %1427 = vrcp.f32 %v794_v8  ;;  %vm801_vm13 = vweird.f32 %v1424_v1  ;;  %v836_v23 = vand.u32 2147483648, %v794_v8 }
 0x189   : > { %v811_v6 = vmul.f32 %v1426_v5, %v793_v53  ;;  %1429 = vtanh.f32 %v782_v3  ;;  %vm816_vm14 = vweird.f32 %v1426_v5  ;;  %vm802_vm1 = vmor %vm800_vm15, %vm801_vm13  ;;  %vm830_vm6 = vweird.f32 %v794_v8 }
 0x18a   : > { %v797_v4 = vsub.f32 1.0, %v796_v55  ;;  %vm817_vm2 = vmor %vm815_vm0, %vm816_vm14  ;;  %v834_v24 = vand.u32 2147483647, %v794_v8  ;;  %v837_v27 = vor.u32 1.1754944e-38, %v836_v23 }
 0x18b   : > { %v812_v9 = vsub.f32 1.0, %v811_v6 }
 0x18c   : > { %v798_v7 = vmul.f32 %v1424_v1, %v797_v4  ;;  %vm835_vm8 = vcmp.eq.f32.partialorder %v834_v24, 8.507059e+37 }
 0x18d   : > { %v813_v52 = vmul.f32 %v1426_v5, %v812_v9 }
 0x18e   : > { %v1428_v50 = vpop.eup %1427  ;;  %v799_v2 = vadd.f32 %v1424_v1, %v798_v7 }
 0x18f   : > { %v826_v26 = vmul.f32 %v1428_v50, %v794_v8  ;;  %v814_v10 = vadd.f32 %v1426_v5, %v813_v52  ;;  %v1430_v13 = vpop.eup %1429  ;;  %vm831_vm5 = vweird.f32 %v1428_v50 }
 0x190   : > { %v803_v12 = vsel %vm802_vm1, %v1424_v1, %v799_v2  ;;  %vm832_vm7 = vmor %vm830_vm6, %vm831_vm5 }
 0x191   : > { %v827_v14 = vsub.f32 1.0, %v826_v26  ;;  %v808_v15 = vsel %vm805_vm3, %v807_v54, %v803_v12  ;;  %v818_v16 = vsel %vm817_vm2, %v1426_v5, %v814_v10 }
 0x192   : > { %v823_v17 = vsel %vm820_vm4, %v822_v11, %v818_v16  ;;  %v842_v18 = vmul.f32 %v1430_v13, %v808_v15 }
 0x193   : > { %v828_v19 = vmul.f32 %v1428_v50, %v827_v14  ;;  %v841_v20 = vmul.f32 %v823_v17, %v2017_v60 }
 0x195   : > { %v2090_v21 = vadd.f32 %v842_v18, %v841_v20  ;;  %v829_v22 = vadd.f32 %v1428_v50, %v828_v19 }
 0x197   : > { %1431 = vtanh.f32 %v2090_v21  ;;  %v833_v25 = vsel %vm832_vm7, %v1428_v50, %v829_v22 }
 0x198   : > { %v838_v29 = vsel %vm835_vm8, %v837_v27, %v833_v25  ;;  %v2230_v25 = vld [vmem:[#allocation39_spill] sm:$0xff] }
 0x19d   : > { %v1432_v28 = vpop.eup %1431 }
 0x19e   : > { %v845_v30 = vmul.f32 %v1432_v28, %v838_v29  ;;  %v2231_v28 = vld [vmem:[#allocation40_spill] sm:$0xff] }
 0x1a0   : > { %1347 = vst [vmem:[%s1580_s14 + $0x8] sm:$0xff] %v845_v30  ;;  %875 = vmatmul.f32.vlgmr.msrb.gmra.mxu0 %v845_v30  ;;  %895 = vmatmul.f32.vlgmr.msrb.gmra.mxu1 %v845_v30 }
 0x1a1   : > { %915 = vmatmul.f32.vlgmr.msrb.gmra.mxu2 %v845_v30  ;;  %935 = vmatmul.f32.vlgmr.msrb.gmra.mxu3 %v845_v30 }
 0x21d   : > { %v876_v60 = vpop.f32.mrf.mxu0  ;;  %v896_v31 = vpop.f32.mrf.mxu1 }
 0x21e   : > { %v939_v33 = vadd.f32 %v876_v60, %v2226_v32  ;;  %v940_v35 = vadd.f32 %v896_v31, %v2227_v34  ;;  %v2232_v32 = vld [vmem:[#allocation41_spill] sm:$0xff] }
 0x220   : > { %v1348_v36 = vmul.f32 -1.442695, %v939_v33  ;;  %v1349_v37 = vmul.f32 -1.442695, %v940_v35 }
 0x222   : > { %1433 = vpow2.f32 %v1348_v36 }
 0x223   : > { %1435 = vpow2.f32 %v1349_v37 }
 0x224   : > { %v916_v38 = vpop.f32.mrf.mxu2  ;;  %v936_v47 = vpop.f32.mrf.mxu3 }
 0x225   : > { %v941_v40 = vadd.f32 %v916_v38, %v2228_v39  ;;  %v942_v56 = vadd.f32 %v936_v47, %v2229_v58 }
 0x227   : > { %v1350_v41 = vmul.f32 -1.442695, %v941_v40 }
 0x228   : > { %v1434_v42 = vpop.eup %1433 }
 0x229   : > { %v1436_v44 = vpop.eup %1435  ;;  %v952_v45 = vadd.f32 1.0, %v1434_v42  ;;  %1437 = vpow2.f32 %v1350_v41 }
 0x22a   : > { %v953_v46 = vadd.f32 1.0, %v1436_v44  ;;  %v2233_v44 = vld [vmem:[#allocation42_spill] sm:$0xff] }
 0x22b   : > { %1439 = vrcp.f32 %v952_v45  ;;  %v966_v63 = vand.u32 2147483648, %v952_v45  ;;  %v964_v55 = vand.u32 2147483647, %v952_v45  ;;  %vm960_vm11 = vweird.f32 %v952_v45 }
 0x22c   : > { %1441 = vrcp.f32 %v953_v46  ;;  %v981_v3 = vand.u32 2147483648, %v953_v46  ;;  %v979_v4 = vand.u32 2147483647, %v953_v46  ;;  %vm975_vm12 = vweird.f32 %v953_v46 }
 0x22d   : > { %v967_v7 = vor.u32 1.1754944e-38, %v966_v63  ;;  %vm965_vm15 = vcmp.eq.f32.partialorder %v964_v55, 8.507059e+37 }
 0x22e   : > { %v982_v52 = vor.u32 1.1754944e-38, %v981_v3  ;;  %vm980_vm0 = vcmp.eq.f32.partialorder %v979_v4, 8.507059e+37 }
 0x22f   : > { %v1438_v48 = vpop.eup %1437 }
 0x230   : > { %v954_v49 = vadd.f32 1.0, %v1438_v48 }
 0x231   : > { %v1440_v43 = vpop.eup %1439 }
 0x232   : > { %v1442_v53 = vpop.eup %1441  ;;  %v956_v61 = vmul.f32 %v1440_v43, %v952_v45  ;;  %1443 = vrcp.f32 %v954_v49  ;;  %vm961_vm9 = vweird.f32 %v1440_v43  ;;  %v996_v16 = vand.u32 2147483648, %v954_v49 }
 0x233   : > { %v971_v0 = vmul.f32 %v1442_v53, %v953_v46  ;;  %1445 = vtanh.f32 %v942_v56  ;;  %vm976_vm10 = vweird.f32 %v1442_v53  ;;  %vm962_vm13 = vmor %vm960_vm11, %vm961_vm9  ;;  %vm990_vm2 = vweird.f32 %v954_v49 }
 0x234   : > { %v957_v8 = vsub.f32 1.0, %v956_v61  ;;  %vm977_vm14 = vmor %vm975_vm12, %vm976_vm10  ;;  %v994_v17 = vand.u32 2147483647, %v954_v49  ;;  %v997_v19 = vor.u32 1.1754944e-38, %v996_v16 }
 0x235   : > { %v972_v1 = vsub.f32 1.0, %v971_v0 }
 0x236   : > { %v958_v5 = vmul.f32 %v1440_v43, %v957_v8  ;;  %vm995_vm4 = vcmp.eq.f32.partialorder %v994_v17, 8.507059e+37 }
 0x237   : > { %v973_v6 = vmul.f32 %v1442_v53, %v972_v1 }
 0x238   : > { %v1444_v9 = vpop.eup %1443  ;;  %v959_v51 = vadd.f32 %v1440_v43, %v958_v5 }
 0x239   : > { %v986_v59 = vmul.f32 %v1444_v9, %v954_v49  ;;  %v974_v62 = vadd.f32 %v1442_v53, %v973_v6  ;;  %v1446_v50 = vpop.eup %1445  ;;  %vm991_vm1 = vweird.f32 %v1444_v9 }
 0x23a   : > { %v963_v57 = vsel %vm962_vm13, %v1440_v43, %v959_v51  ;;  %vm992_vm3 = vmor %vm990_vm2, %vm991_vm1 }
 0x23b   : > { %v987_v2 = vsub.f32 1.0, %v986_v59  ;;  %v968_v26 = vsel %vm965_vm15, %v967_v7, %v963_v57  ;;  %v978_v54 = vsel %vm977_vm14, %v1442_v53, %v974_v62 }
 0x23c   : > { %v983_v10 = vsel %vm980_vm0, %v982_v52, %v978_v54  ;;  %v1002_v11 = vmul.f32 %v1446_v50, %v968_v26 }
 0x23d   : > { %v988_v12 = vmul.f32 %v1444_v9, %v987_v2  ;;  %v1001_v13 = vmul.f32 %v983_v10, %v2090_v21 }
 0x23f   : > { %v2099_v14 = vadd.f32 %v1002_v11, %v1001_v13  ;;  %v989_v15 = vadd.f32 %v1444_v9, %v988_v12 }
 0x241   : > { %1447 = vtanh.f32 %v2099_v14  ;;  %v993_v18 = vsel %vm992_vm3, %v1444_v9, %v989_v15 }
 0x242   : > { %v998_v22 = vsel %vm995_vm4, %v997_v19, %v993_v18 }
 0x247   : > { %v1448_v20 = vpop.eup %1447 }
 0x248   : > { %v1005_v23 = vmul.f32 %v1448_v20, %v998_v22 }
 0x24a   : > { %1351 = vst [vmem:[%s1580_s14 + $0x10] sm:$0xff] %v1005_v23  ;;  %1035 = vmatmul.f32.vlgmr.msra.gmra.mxu0 %v1005_v23  ;;  %1055 = vmatmul.f32.vlgmr.msra.gmra.mxu1 %v1005_v23 }
 0x24b   : > { %1075 = vmatmul.f32.vlgmr.msra.gmra.mxu2 %v1005_v23  ;;  %1095 = vmatmul.f32.vlgmr.msra.gmra.mxu3 %v1005_v23 }
 0x2c7   : > { %v1036_v21 = vpop.f32.mrf.mxu0  ;;  %v1056_v24 = vpop.f32.mrf.mxu1 }
 0x2c8   : > { %v1099_v27 = vadd.f32 %v1036_v21, %v2230_v25  ;;  %v1100_v29 = vadd.f32 %v1056_v24, %v2231_v28 }
 0x2ca   : > { %v1352_v30 = vmul.f32 -1.442695, %v1099_v27  ;;  %v1353_v60 = vmul.f32 -1.442695, %v1100_v29 }
 0x2cc   : > { %1449 = vpow2.f32 %v1352_v30 }
 0x2cd   : > { %1451 = vpow2.f32 %v1353_v60 }
 0x2ce   : > { %v1076_v31 = vpop.f32.mrf.mxu2  ;;  %v1096_v39 = vpop.f32.mrf.mxu3 }
 0x2cf   : > { %v1101_v33 = vadd.f32 %v1076_v31, %v2232_v32  ;;  %v1102_v45 = vadd.f32 %v1096_v39, %v2233_v44 }
 0x2d1   : > { %v1354_v34 = vmul.f32 -1.442695, %v1101_v33 }
 0x2d2   : > { %v1450_v35 = vpop.eup %1449 }
 0x2d3   : > { %v1452_v36 = vpop.eup %1451  ;;  %v1112_v37 = vadd.f32 1.0, %v1450_v35  ;;  %1453 = vpow2.f32 %v1354_v34 }
 0x2d4   : > { %v1113_v38 = vadd.f32 1.0, %v1452_v36 }
 0x2d5   : > { %1455 = vrcp.f32 %v1112_v37  ;;  %v1126_v58 = vand.u32 2147483648, %v1112_v37  ;;  %v1124_v61 = vand.u32 2147483647, %v1112_v37  ;;  %vm1120_vm7 = vweird.f32 %v1112_v37 }
 0x2d6   : > { %1457 = vrcp.f32 %v1113_v38  ;;  %v1141_v56 = vand.u32 2147483648, %v1113_v38  ;;  %v1139_v8 = vand.u32 2147483647, %v1113_v38  ;;  %vm1135_vm8 = vweird.f32 %v1113_v38 }
 0x2d7   : > { %v1127_v5 = vor.u32 1.1754944e-38, %v1126_v58  ;;  %vm1125_vm11 = vcmp.eq.f32.partialorder %v1124_v61, 8.507059e+37 }
 0x2d8   : > { %v1142_v6 = vor.u32 1.1754944e-38, %v1141_v56  ;;  %vm1140_vm12 = vcmp.eq.f32.partialorder %v1139_v8, 8.507059e+37 }
 0x2d9   : > { %v1454_v40 = vpop.eup %1453 }
 0x2da   : > { %v1114_v41 = vadd.f32 1.0, %v1454_v40 }
 0x2db   : > { %v1456_v42 = vpop.eup %1455 }
 0x2dc   : > { %v1458_v46 = vpop.eup %1457  ;;  %v1116_v47 = vmul.f32 %v1456_v42, %v1112_v37  ;;  %1459 = vrcp.f32 %v1114_v41  ;;  %vm1121_vm5 = vweird.f32 %v1456_v42  ;;  %v1156_v54 = vand.u32 2147483648, %v1114_v41 }
 0x2dd   : > { %v1131_v48 = vmul.f32 %v1458_v46, %v1113_v38  ;;  %1461 = vtanh.f32 %v1102_v45  ;;  %vm1136_vm6 = vweird.f32 %v1458_v46  ;;  %vm1122_vm9 = vmor %vm1120_vm7, %vm1121_vm5  ;;  %vm1150_vm14 = vweird.f32 %v1114_v41 }
 0x2de   : > { %v1117_v49 = vsub.f32 1.0, %v1116_v47  ;;  %vm1137_vm10 = vmor %vm1135_vm8, %vm1136_vm6  ;;  %v1154_v10 = vand.u32 2147483647, %v1114_v41  ;;  %v1157_v12 = vor.u32 1.1754944e-38, %v1156_v54 }
 0x2df   : > { %v1132_v43 = vsub.f32 1.0, %v1131_v48 }
 0x2e0   : > { %v1118_v53 = vmul.f32 %v1456_v42, %v1117_v49  ;;  %vm1155_vm0 = vcmp.eq.f32.partialorder %v1154_v10, 8.507059e+37 }
 0x2e1   : > { %v1133_v0 = vmul.f32 %v1458_v46, %v1132_v43 }
 0x2e2   : > { %v1460_v1 = vpop.eup %1459  ;;  %v1119_v63 = vadd.f32 %v1456_v42, %v1118_v53 }
 0x2e3   : > { %v1146_v3 = vmul.f32 %v1460_v1, %v1114_v41  ;;  %v1134_v55 = vadd.f32 %v1458_v46, %v1133_v0  ;;  %v1462_v9 = vpop.eup %1461  ;;  %vm1151_vm13 = vweird.f32 %v1460_v1 }
 0x2e4   : > { %v1123_v4 = vsel %vm1122_vm9, %v1456_v42, %v1119_v63  ;;  %vm1152_vm15 = vmor %vm1150_vm14, %vm1151_vm13 }
 0x2e5   : > { %v1147_v51 = vsub.f32 1.0, %v1146_v3  ;;  %v1128_v59 = vsel %vm1125_vm11, %v1127_v5, %v1123_v4  ;;  %v1138_v7 = vsel %vm1137_vm10, %v1458_v46, %v1134_v55 }
 0x2e6   : > { %v1143_v62 = vsel %vm1140_vm12, %v1142_v6, %v1138_v7  ;;  %v1162_v52 = vmul.f32 %v1462_v9, %v1128_v59 }
 0x2e7   : > { %v1148_v57 = vmul.f32 %v1460_v1, %v1147_v51  ;;  %v1161_v50 = vmul.f32 %v1143_v62, %v2099_v14 }
 0x2e9   : > { %v1163_v2 = vadd.f32 %v1162_v52, %v1161_v50  ;;  %v1149_v26 = vadd.f32 %v1460_v1, %v1148_v57 }
 0x2eb   : > { %1463 = vtanh.f32 %v1163_v2  ;;  %1166 = vst [vmem:[#allocation4] sm:$0xff] %v1163_v2  ;;  %v1153_v11 = vsel %vm1152_vm15, %v1460_v1, %v1149_v26 }
 0x2ec   : > { %v1158_v15 = vsel %vm1155_vm0, %v1157_v12, %v1153_v11 }
 0x2f1   : > { %v1464_v13 = vpop.eup %1463 }
 0x2f2   : > { %v1165_v16 = vmul.f32 %v1464_v13, %v1158_v15 }
 0x2f4   : > { %1167 = vst [vmem:[#allocation3] sm:$0xff] %v1165_v16 }
 0x2f5   : > { %1355 = vst [vmem:[%s1580_s14 + $0x18] sm:$0xff] %v1165_v16 }
 0x2f6 PF: > { %s14_s19 = sadd.s32 1, %s1503_s19   ;;  %s2234_s15 = smov %s1495_s17 }
 0x2f7   : > { %p11_p8 = scmp.ge.s32.totalorder %s14_s19, 6   ;;  %s2235_s16 = smov %s1499_s18 }
 0x2f8   : > { %s2236_s17 = smov %s2239_s20  ;;  %s2237_s18 = smov %s2243_s21 }
 0x2f9   :  { %13 = sbr.rel (!%p11_p8) target bundleno = 3 (0x3), region = 86 }

</bundles_post_ra>
